<compile_context>
chip_gen: v6e
topology: v6e:2x2x1
jax: 0.10.0
libtpu: 0.0.40
codegen_flags: <defaults>
</compile_context>

<pallas_src>
import functools

import jax
import jax.numpy as jnp
from jax.experimental import pallas as pl
from jax.experimental.pallas import tpu as pltpu


# ----------------------------- kernel ---------------------------------------

def encoder_layer_kernel(p_ref,                      # SMEM (2,) sigmoid(weight)
                         xq_ref, xkv_ref,            # (1,TQ,D), (1,S,D)
                         x0_ref, mask_ref,           # (1,TQ,D), (1,1,S)
                         wq_ref, wkv_ref, wo_ref,    # (D,Hq), (D,2Hq), (Hq,D) bf16
                         w1_ref, b1_ref,             # (D,d_ff) bf16, (1,d_ff) f32
                         w2_ref, b2_ref,             # (d_ff,D) bf16, (1,D) f32
                         g0_ref, be0_ref,            # (1,D), (1,D)  layer_norm[0]
                         g1_ref, be1_ref,            # (1,D), (1,D)  layer_norm[1]
                         o_ref,                      # (1,TQ,D)
                         *, n_head, d_qkv):
    f32 = jnp.float32
    bf16 = jnp.bfloat16
    Hq = n_head * d_qkv

    xq = xq_ref[0].astype(f32)                       # (TQ, D) residual path
    x0 = x0_ref[0].astype(f32)                       # (TQ, D)
    mask = mask_ref[0]                               # (1, S) -> broadcast over queries
    p0 = p_ref[0]
    p1 = p_ref[1]

    def layer_norm(v, gamma, beta, eps=1e-5):
        mu = jnp.mean(v, axis=-1, keepdims=True)
        var = jnp.mean((v - mu) ** 2, axis=-1, keepdims=True)
        return (v - mu) * jax.lax.rsqrt(var + eps) * gamma + beta

    # ---- fused multi-head self attention --------------------------------
    xq_bf = xq_ref[0].astype(bf16)                   # (TQ, D)
    xkv_bf = xkv_ref[0].astype(bf16)                 # (S, D)

    # One wide matmul for Q (query tile) and one for K|V (full sequence);
    # 1/sqrt(d_qkv) is pre-folded into wq in the wrapper.
    q_all = jnp.dot(xq_bf, wq_ref[...],
                    preferred_element_type=f32).astype(bf16)        # (TQ, Hq)
    kv_all = jnp.dot(xkv_bf, wkv_ref[...],
                     preferred_element_type=f32)                    # (S, 2*Hq)
    k_all = kv_all[:, :Hq].astype(bf16)
    v_all = kv_all[:, Hq:].astype(bf16)

    ctx_heads = []
    for h in range(n_head):                          # static unroll, H small
        sl = slice(h * d_qkv, (h + 1) * d_qkv)
        s = jnp.dot(q_all[:, sl], k_all[:, sl].T,
                    preferred_element_type=f32)                     # (TQ, S)
        s = jnp.where(mask > 0, s, f32(-1e9))
        s = s - jnp.max(s, axis=-1, keepdims=True)
        e = jnp.exp(s)                                              # f32 (v5e-safe)
        inv = pl.reciprocal(jnp.sum(e, axis=-1, keepdims=True), approx=True)
        p_attn = (e * inv).astype(bf16)
        ctx_heads.append(jnp.dot(p_attn, v_all[:, sl],
                                 preferred_element_type=f32))       # (TQ, dq)

    ctx = jnp.concatenate(ctx_heads, axis=-1).astype(bf16)          # (TQ, Hq)
    attn_out = jnp.dot(ctx, wo_ref[...], preferred_element_type=f32)  # (TQ, D)

    # ---- weighted residual 1 + layer norm 0 ------------------------------
    h1 = layer_norm(xq * p0 + x0 * (1.0 - p0) + attn_out,
                    g0_ref[0], be0_ref[0])

    # ---- position-wise feed forward ---------------------------------------
    ff = jnp.dot(h1.astype(bf16), w1_ref[...],
                 preferred_element_type=f32) + b1_ref[0]
    ff = jnp.maximum(ff, 0.0)
    ff = jnp.dot(ff.astype(bf16), w2_ref[...],
                 preferred_element_type=f32) + b2_ref[0]

    # ---- weighted residual 2 + layer norm 1 --------------------------------
    h2 = layer_norm(h1 * p1 + x0 * (1.0 - p1) + ff,
                    g1_ref[0], be1_ref[0])

    o_ref[0] = h2.astype(o_ref.dtype)


# ----------------------------- wrapper ---------------------------------------

def _pick_tq(S, max_tq=256):
    if S <= max_tq:
        return S
    for t in (256, 128, 64, 32, 16, 8):
        if S % t == 0:
            return t
    return S  # irregular S: fall back to a single query tile


def _vmem_budget_bytes(S, TQ, D, Hq, d_ff):
    f32b, bf16b = 4, 2
    acts = 2 * (TQ * D + S * D + TQ * D + S) * f32b          # dbl-buffered inputs
    outs = 2 * TQ * D * f32b
    wts = 2 * (D * Hq + D * 2 * Hq + Hq * D + D * d_ff + d_ff * D) * bf16b \
        + 2 * (d_ff + 5 * D) * f32b
    inter = (TQ * Hq + 2 * S * Hq) * f32b + 2 * TQ * S * f32b \
        + TQ * Hq * f32b + TQ * d_ff * f32b + 4 * TQ * D * f32b
    est = acts + outs + wts + inter
    # headroom, but stay well inside v7x's 64 MiB physical VMEM
    return int(min(max(int(1.5 * est), 32 * 2**20), 48 * 2**20))


def embed_residual_encoder_layer(x, mask, x0, params, *, max_tq=256):
    """x, x0: (B, S, D) f32; mask: (B, 1, S) f32 (1 = keep)."""
    B, S, D = x.shape
    H, _, dq = params["wq"].shape
    d_ff = params["w1"].shape[1]
    Hq = H * dq

    TQ = _pick_tq(S, max_tq)
    n_qt = S // TQ

    p = jax.nn.sigmoid(params["gate"]).astype(jnp.float32)          # (2,)
    scale = 1.0 / jnp.sqrt(jnp.float32(dq))

    # Lane-dense 2D weights; scale folded into Q projection; MXU operands bf16.
    wq2d = (jnp.transpose(params["wq"], (1, 0, 2)).reshape(D, Hq)
            * scale).astype(jnp.bfloat16)                           # (D, Hq)
    wk2d = jnp.transpose(params["wk"], (1, 0, 2)).reshape(D, Hq)
    wv2d = jnp.transpose(params["wv"], (1, 0, 2)).reshape(D, Hq)
    wkv2d = jnp.concatenate([wk2d, wv2d], axis=1).astype(jnp.bfloat16)  # (D, 2Hq)
    wo2d = params["wo"].reshape(Hq, D).astype(jnp.bfloat16)         # (Hq, D)
    w1 = params["w1"].astype(jnp.bfloat16)
    w2 = params["w2"].astype(jnp.bfloat16)

    kernel = functools.partial(encoder_layer_kernel, n_head=H, d_qkv=dq)

    def const2(shape):
        return pl.BlockSpec(shape, lambda b, q: (0, 0))

    in_specs = [
        pl.BlockSpec(memory_space=pltpu.MemorySpace.SMEM),          # p gates
        pl.BlockSpec((1, TQ, D), lambda b, q: (b, q, 0)),           # x (query tile)
        pl.BlockSpec((1, S, D), lambda b, q: (b, 0, 0)),            # x (full, K/V)
        pl.BlockSpec((1, TQ, D), lambda b, q: (b, q, 0)),           # x0 (query tile)
        pl.BlockSpec((1, 1, S), lambda b, q: (b, 0, 0)),            # mask
        const2((D, Hq)),                                            # wq (scaled)
        const2((D, 2 * Hq)),                                        # wk | wv
        const2((Hq, D)),                                            # wo
        const2((D, d_ff)),                                          # w1
        const2((1, d_ff)),                                          # b1
        const2((d_ff, D)),                                          # w2
        const2((1, D)),                                             # b2
        const2((1, D)),                                             # gamma0
        const2((1, D)),                                             # beta0
        const2((1, D)),                                             # gamma1
        const2((1, D)),                                             # beta1
    ]
    out_spec = pl.BlockSpec((1, TQ, D), lambda b, q: (b, q, 0))

    return pl.pallas_call(
        kernel,
        out_shape=jax.ShapeDtypeStruct((B, S, D), jnp.float32),
        grid=(B, n_qt),
        in_specs=in_specs,
        out_specs=out_spec,
        compiler_params=pltpu.CompilerParams(
            dimension_semantics=("parallel", "parallel"),
            vmem_limit_bytes=_vmem_budget_bytes(S, TQ, D, Hq, d_ff)),
    )(
        p, x, x, x0, mask,
        wq2d, wkv2d, wo2d,
        w1, params["b1"].reshape(1, d_ff),
        w2, params["b2"].reshape(1, D),
        params["gamma0"].reshape(1, D), params["beta0"].reshape(1, D),
        params["gamma1"].reshape(1, D), params["beta1"].reshape(1, D),
    )


# ----------------------------- pure-JAX reference -----------------------------

def reference(x, mask, x0, params):
    p = jax.nn.sigmoid(params["gate"])
    d_qkv = params["wq"].shape[-1]

    def layer_norm(v, g, b, eps=1e-5):
        mu = jnp.mean(v, axis=-1, keepdims=True)
        var = jnp.mean((v - mu) ** 2, axis=-1, keepdims=True)
        return (v - mu) / jnp.sqrt(var + eps) * g + b

    q = jnp.einsum("bsd,hdk->bhsk", x, params["wq"])
    k = jnp.einsum("bsd,hdk->bhsk", x, params["wk"])
    v = jnp.einsum("bsd,hdk->bhsk", x, params["wv"])
    s = jnp.einsum("bhqk,bhmk->bhqm", q, k) / jnp.sqrt(jnp.float32(d_qkv))
    s = jnp.where(mask[:, None, :, :] > 0, s, -1e9)       # (B,1,S) -> (B,1,1,S)
    a = jax.nn.softmax(s, axis=-1)
    ctx = jnp.einsum("bhqm,bhmk->bhqk", a, v)
    attn = jnp.einsum("bhqk,hkd->bqd", ctx, params["wo"])

    h1 = layer_norm(x * p[0] + x0 * (1 - p[0]) + attn,
                    params["gamma0"], params["beta0"])
    ff = jnp.maximum(h1 @ params["w1"] + params["b1"], 0.0) @ params["w2"] + params["b2"]
    return layer_norm(h1 * p[1] + x0 * (1 - p[1]) + ff,
                      params["gamma1"], params["beta1"])


# ----------------------------- main ------------------------------------------

if __name__ == "__main__":
    # small shapes consistent with the module (scaled down from 256/1024/4/32)
    B, S, D, d_ff, H, d_qkv = 2, 8, 32, 64, 4, 8

    key = jax.random.PRNGKey(0)
    ks = jax.random.split(key, 10)

    params = {
        "gate":   jnp.zeros((2,), jnp.float32),             # nn.Parameter(torch.zeros(2))
        "wq":     jax.random.normal(ks[0], (H, D, d_qkv), jnp.float32) / jnp.sqrt(D),
        "wk":     jax.random.normal(ks[1], (H, D, d_qkv), jnp.float32) / jnp.sqrt(D),
        "wv":     jax.random.normal(ks[2], (H, D, d_qkv), jnp.float32) / jnp.sqrt(D),
        "wo":     jax.random.normal(ks[3], (H, d_qkv, D), jnp.float32) / jnp.sqrt(d_qkv),
        "w1":     jax.random.normal(ks[4], (D, d_ff), jnp.float32) / jnp.sqrt(D),
        "b1":     jnp.zeros((d_ff,), jnp.float32),
        "w2":     jax.random.normal(ks[5], (d_ff, D), jnp.float32) / jnp.sqrt(d_ff),
        "b2":     jnp.zeros((D,), jnp.float32),
        "gamma0": jnp.ones((D,), jnp.float32),
        "beta0":  jnp.zeros((D,), jnp.float32),
        "gamma1": jnp.ones((D,), jnp.float32),
        "beta1":  jnp.zeros((D,), jnp.float32),
    }

    x = jax.random.normal(ks[6], (B, S, D), jnp.float32)
    x0 = jax.random.normal(ks[7], (B, S, D), jnp.float32)
    # mask: last two positions of batch 1 are padding
    mask = jnp.ones((B, 1, S), jnp.float32).at[1, 0, -2:].set(0.0)

    out = embed_residual_encoder_layer(x, mask, x0, params)
    out = jax.block_until_ready(out)

    ref = reference(x, mask, x0, params)
    assert out.shape == (B, S, D)
    # bf16 MXU inputs (f32 accumulate) vs. pure-f32 reference -> loosened tol.
    err = jnp.max(jnp.abs(out - ref))
    assert jnp.allclose(out, ref, rtol=3e-2, atol=3e-2), f"max abs err {err}"

    print("KERNEL_OK")
</pallas_src>

<mosaic_0001>
module attributes {stable_mosaic.version = 11 : i64} {
  func.func @encoder_layer_kernel(%arg0: i32, %arg1: i32, %arg2: memref<2xf32, #tpu.memory_space<smem>>, %arg3: memref<1x8x32xf32, #tpu.memory_space<vmem>>, %arg4: memref<1x8x32xf32, #tpu.memory_space<vmem>>, %arg5: memref<1x8x32xf32, #tpu.memory_space<vmem>>, %arg6: memref<1x1x8xf32, #tpu.memory_space<vmem>>, %arg7: memref<32x32xbf16, #tpu.memory_space<vmem>>, %arg8: memref<32x64xbf16, #tpu.memory_space<vmem>>, %arg9: memref<32x32xbf16, #tpu.memory_space<vmem>>, %arg10: memref<32x64xbf16, #tpu.memory_space<vmem>>, %arg11: memref<1x64xf32, #tpu.memory_space<vmem>>, %arg12: memref<64x32xbf16, #tpu.memory_space<vmem>>, %arg13: memref<1x32xf32, #tpu.memory_space<vmem>>, %arg14: memref<1x32xf32, #tpu.memory_space<vmem>>, %arg15: memref<1x32xf32, #tpu.memory_space<vmem>>, %arg16: memref<1x32xf32, #tpu.memory_space<vmem>>, %arg17: memref<1x32xf32, #tpu.memory_space<vmem>>, %arg18: memref<1x8x32xf32, #tpu.memory_space<vmem>>) attributes {dimension_semantics = [#tpu.dimension_semantics<parallel>, #tpu.dimension_semantics<parallel>], iteration_bounds = array<i64: 2, 1>, scalar_prefetch = 0 : i64, scratch_operands = 0 : i64, tpu.core_type = #tpu.core_type<tc>, window_params = [{transform_indices = @transform_0, window_bounds = array<i64: 2>}, {transform_indices = @transform_1, window_bounds = array<i64: 1, 8, 32>}, {transform_indices = @transform_2, window_bounds = array<i64: 1, 8, 32>}, {transform_indices = @transform_3, window_bounds = array<i64: 1, 8, 32>}, {transform_indices = @transform_4, window_bounds = array<i64: 1, 1, 8>}, {pipeline_mode = #tpu.pipeline_mode<synchronous>, transform_indices = @transform_5, window_bounds = array<i64: 32, 32>}, {pipeline_mode = #tpu.pipeline_mode<synchronous>, transform_indices = @transform_6, window_bounds = array<i64: 32, 64>}, {pipeline_mode = #tpu.pipeline_mode<synchronous>, transform_indices = @transform_7, window_bounds = array<i64: 32, 32>}, {pipeline_mode = #tpu.pipeline_mode<synchronous>, transform_indices = @transform_8, window_bounds = array<i64: 32, 64>}, {pipeline_mode = #tpu.pipeline_mode<synchronous>, transform_indices = @transform_9, window_bounds = array<i64: 1, 64>}, {pipeline_mode = #tpu.pipeline_mode<synchronous>, transform_indices = @transform_10, window_bounds = array<i64: 64, 32>}, {pipeline_mode = #tpu.pipeline_mode<synchronous>, transform_indices = @transform_11, window_bounds = array<i64: 1, 32>}, {pipeline_mode = #tpu.pipeline_mode<synchronous>, transform_indices = @transform_12, window_bounds = array<i64: 1, 32>}, {pipeline_mode = #tpu.pipeline_mode<synchronous>, transform_indices = @transform_13, window_bounds = array<i64: 1, 32>}, {pipeline_mode = #tpu.pipeline_mode<synchronous>, transform_indices = @transform_14, window_bounds = array<i64: 1, 32>}, {pipeline_mode = #tpu.pipeline_mode<synchronous>, transform_indices = @transform_15, window_bounds = array<i64: 1, 32>}, {transform_indices = @transform_16, window_bounds = array<i64: 1, 8, 32>}]} {
    %c0 = arith.constant 0 : index
    %c0_0 = arith.constant 0 : index
    %c0_1 = arith.constant 0 : index
    %0 = vector.load %arg3[%c0, %c0_0, %c0_1] : memref<1x8x32xf32, #tpu.memory_space<vmem>>, vector<1x8x32xf32>
    %1 = vector.shape_cast %0 : vector<1x8x32xf32> to vector<8x32xf32>
    %c0_2 = arith.constant 0 : index
    %c0_3 = arith.constant 0 : index
    %c0_4 = arith.constant 0 : index
    %2 = vector.load %arg5[%c0_2, %c0_3, %c0_4] : memref<1x8x32xf32, #tpu.memory_space<vmem>>, vector<1x8x32xf32>
    %3 = vector.shape_cast %2 : vector<1x8x32xf32> to vector<8x32xf32>
    %c0_5 = arith.constant 0 : index
    %c0_6 = arith.constant 0 : index
    %c0_7 = arith.constant 0 : index
    %4 = vector.load %arg6[%c0_5, %c0_6, %c0_7] : memref<1x1x8xf32, #tpu.memory_space<vmem>>, vector<1x1x8xf32>
    %5 = vector.shape_cast %4 : vector<1x1x8xf32> to vector<1x8xf32>
    %c0_8 = arith.constant 0 : index
    %6 = memref.load %arg2[%c0_8] : memref<2xf32, #tpu.memory_space<smem>>
    %c1 = arith.constant 1 : index
    %7 = memref.load %arg2[%c1] : memref<2xf32, #tpu.memory_space<smem>>
    %c0_9 = arith.constant 0 : index
    %c0_10 = arith.constant 0 : index
    %c0_11 = arith.constant 0 : index
    %8 = vector.load %arg3[%c0_9, %c0_10, %c0_11] : memref<1x8x32xf32, #tpu.memory_space<vmem>>, vector<1x8x32xf32>
    %9 = vector.shape_cast %8 : vector<1x8x32xf32> to vector<8x32xf32>
    %10 = arith.truncf %9 : vector<8x32xf32> to vector<8x32xbf16>
    %c0_12 = arith.constant 0 : index
    %c0_13 = arith.constant 0 : index
    %c0_14 = arith.constant 0 : index
    %11 = vector.load %arg4[%c0_12, %c0_13, %c0_14] : memref<1x8x32xf32, #tpu.memory_space<vmem>>, vector<1x8x32xf32>
    %12 = vector.shape_cast %11 : vector<1x8x32xf32> to vector<8x32xf32>
    %13 = arith.truncf %12 : vector<8x32xf32> to vector<8x32xbf16>
    %c0_15 = arith.constant 0 : index
    %c0_16 = arith.constant 0 : index
    %14 = vector.load %arg7[%c0_15, %c0_16] : memref<32x32xbf16, #tpu.memory_space<vmem>>, vector<32x32xbf16>
    %cst = arith.constant dense<0.000000e+00> : vector<8x32xf32>
    %15 = tpu.matmul %10, %14, %cst {dimension_numbers = #tpu.dot_dimension_numbers<[1], [0], [0], [1], [0, 0, 1, 1], [], []>} : vector<8x32xbf16>, vector<32x32xbf16>, vector<8x32xf32> -> vector<8x32xf32>
    %16 = arith.truncf %15 : vector<8x32xf32> to vector<8x32xbf16>
    %c0_17 = arith.constant 0 : index
    %c0_18 = arith.constant 0 : index
    %17 = vector.load %arg8[%c0_17, %c0_18] : memref<32x64xbf16, #tpu.memory_space<vmem>>, vector<32x64xbf16>
    %cst_19 = arith.constant dense<0.000000e+00> : vector<8x64xf32>
    %18 = tpu.matmul %13, %17, %cst_19 {dimension_numbers = #tpu.dot_dimension_numbers<[1], [0], [0], [1], [0, 0, 1, 1], [], []>} : vector<8x32xbf16>, vector<32x64xbf16>, vector<8x64xf32> -> vector<8x64xf32>
    %19 = vector.extract_strided_slice %18 {offsets = [0, 0], sizes = [8, 32], strides = [1, 1]} : vector<8x64xf32> to vector<8x32xf32>
    %20 = arith.truncf %19 : vector<8x32xf32> to vector<8x32xbf16>
    %21 = vector.extract_strided_slice %18 {offsets = [0, 32], sizes = [8, 32], strides = [1, 1]} : vector<8x64xf32> to vector<8x32xf32>
    %22 = arith.truncf %21 : vector<8x32xf32> to vector<8x32xbf16>
    %23 = vector.extract_strided_slice %16 {offsets = [0, 0], sizes = [8, 8], strides = [1, 1]} : vector<8x32xbf16> to vector<8x8xbf16>
    %24 = vector.extract_strided_slice %20 {offsets = [0, 0], sizes = [8, 8], strides = [1, 1]} : vector<8x32xbf16> to vector<8x8xbf16>
    %25 = tpu.transpose %24, [1, 0] : vector<8x8xbf16> -> vector<8x8xbf16>
    %cst_20 = arith.constant dense<0.000000e+00> : vector<8x8xf32>
    %26 = tpu.matmul %23, %25, %cst_20 {dimension_numbers = #tpu.dot_dimension_numbers<[1], [0], [0], [1], [0, 0, 1, 1], [], []>} : vector<8x8xbf16>, vector<8x8xbf16>, vector<8x8xf32> -> vector<8x8xf32>
    %cst_21 = arith.constant 0.000000e+00 : f32
    %27 = vector.broadcast %cst_21 : f32 to vector<1x8xf32>
    %28 = arith.cmpf ogt, %5, %27 : vector<1x8xf32>
    %cst_22 = arith.constant -1.000000e+09 : f32
    %29 = vector.shape_cast %28 : vector<1x8xi1> to vector<1x8xi1>
    %30 = vector.broadcast %29 : vector<1x8xi1> to vector<8x8xi1>
    %31 = vector.broadcast %cst_22 : f32 to vector<8x8xf32>
    %32 = arith.select %30, %26, %31 : vector<8x8xi1>, vector<8x8xf32>
    %cst_23 = arith.constant dense<0xFF800000> : vector<8xf32>
    %33 = vector.multi_reduction <maximumf>, %32, %cst_23 [1] : vector<8x8xf32> to vector<8xf32>
    %34 = vector.shape_cast %33 : vector<8xf32> to vector<8x1xf32>
    %35 = vector.broadcast %34 : vector<8x1xf32> to vector<8x8xf32>
    %36 = arith.subf %32, %35 : vector<8x8xf32>
    %37 = math.exp %36 : vector<8x8xf32>
    %cst_24 = arith.constant dense<0.000000e+00> : vector<8xf32>
    %38 = vector.multi_reduction <add>, %37, %cst_24 [1] : vector<8x8xf32> to vector<8xf32>
    %39 = vector.shape_cast %38 : vector<8xf32> to vector<8x1xf32>
    %40 = tpu.reciprocal %39 {approx = true} : vector<8x1xf32> -> vector<8x1xf32>
    %41 = vector.broadcast %40 : vector<8x1xf32> to vector<8x8xf32>
    %42 = arith.mulf %37, %41 : vector<8x8xf32>
    %43 = arith.truncf %42 : vector<8x8xf32> to vector<8x8xbf16>
    %44 = vector.extract_strided_slice %22 {offsets = [0, 0], sizes = [8, 8], strides = [1, 1]} : vector<8x32xbf16> to vector<8x8xbf16>
    %cst_25 = arith.constant dense<0.000000e+00> : vector<8x8xf32>
    %45 = tpu.matmul %43, %44, %cst_25 {dimension_numbers = #tpu.dot_dimension_numbers<[1], [0], [0], [1], [0, 0, 1, 1], [], []>} : vector<8x8xbf16>, vector<8x8xbf16>, vector<8x8xf32> -> vector<8x8xf32>
    %46 = vector.extract_strided_slice %16 {offsets = [0, 8], sizes = [8, 8], strides = [1, 1]} : vector<8x32xbf16> to vector<8x8xbf16>
    %47 = vector.extract_strided_slice %20 {offsets = [0, 8], sizes = [8, 8], strides = [1, 1]} : vector<8x32xbf16> to vector<8x8xbf16>
    %48 = tpu.transpose %47, [1, 0] : vector<8x8xbf16> -> vector<8x8xbf16>
    %cst_26 = arith.constant dense<0.000000e+00> : vector<8x8xf32>
    %49 = tpu.matmul %46, %48, %cst_26 {dimension_numbers = #tpu.dot_dimension_numbers<[1], [0], [0], [1], [0, 0, 1, 1], [], []>} : vector<8x8xbf16>, vector<8x8xbf16>, vector<8x8xf32> -> vector<8x8xf32>
    %cst_27 = arith.constant 0.000000e+00 : f32
    %50 = vector.broadcast %cst_27 : f32 to vector<1x8xf32>
    %51 = arith.cmpf ogt, %5, %50 : vector<1x8xf32>
    %cst_28 = arith.constant -1.000000e+09 : f32
    %52 = vector.shape_cast %51 : vector<1x8xi1> to vector<1x8xi1>
    %53 = vector.broadcast %52 : vector<1x8xi1> to vector<8x8xi1>
    %54 = vector.broadcast %cst_28 : f32 to vector<8x8xf32>
    %55 = arith.select %53, %49, %54 : vector<8x8xi1>, vector<8x8xf32>
    %cst_29 = arith.constant dense<0xFF800000> : vector<8xf32>
    %56 = vector.multi_reduction <maximumf>, %55, %cst_29 [1] : vector<8x8xf32> to vector<8xf32>
    %57 = vector.shape_cast %56 : vector<8xf32> to vector<8x1xf32>
    %58 = vector.broadcast %57 : vector<8x1xf32> to vector<8x8xf32>
    %59 = arith.subf %55, %58 : vector<8x8xf32>
    %60 = math.exp %59 : vector<8x8xf32>
    %cst_30 = arith.constant dense<0.000000e+00> : vector<8xf32>
    %61 = vector.multi_reduction <add>, %60, %cst_30 [1] : vector<8x8xf32> to vector<8xf32>
    %62 = vector.shape_cast %61 : vector<8xf32> to vector<8x1xf32>
    %63 = tpu.reciprocal %62 {approx = true} : vector<8x1xf32> -> vector<8x1xf32>
    %64 = vector.broadcast %63 : vector<8x1xf32> to vector<8x8xf32>
    %65 = arith.mulf %60, %64 : vector<8x8xf32>
    %66 = arith.truncf %65 : vector<8x8xf32> to vector<8x8xbf16>
    %67 = vector.extract_strided_slice %22 {offsets = [0, 8], sizes = [8, 8], strides = [1, 1]} : vector<8x32xbf16> to vector<8x8xbf16>
    %cst_31 = arith.constant dense<0.000000e+00> : vector<8x8xf32>
    %68 = tpu.matmul %66, %67, %cst_31 {dimension_numbers = #tpu.dot_dimension_numbers<[1], [0], [0], [1], [0, 0, 1, 1], [], []>} : vector<8x8xbf16>, vector<8x8xbf16>, vector<8x8xf32> -> vector<8x8xf32>
    %69 = vector.extract_strided_slice %16 {offsets = [0, 16], sizes = [8, 8], strides = [1, 1]} : vector<8x32xbf16> to vector<8x8xbf16>
    %70 = vector.extract_strided_slice %20 {offsets = [0, 16], sizes = [8, 8], strides = [1, 1]} : vector<8x32xbf16> to vector<8x8xbf16>
    %71 = tpu.transpose %70, [1, 0] : vector<8x8xbf16> -> vector<8x8xbf16>
    %cst_32 = arith.constant dense<0.000000e+00> : vector<8x8xf32>
    %72 = tpu.matmul %69, %71, %cst_32 {dimension_numbers = #tpu.dot_dimension_numbers<[1], [0], [0], [1], [0, 0, 1, 1], [], []>} : vector<8x8xbf16>, vector<8x8xbf16>, vector<8x8xf32> -> vector<8x8xf32>
    %cst_33 = arith.constant 0.000000e+00 : f32
    %73 = vector.broadcast %cst_33 : f32 to vector<1x8xf32>
    %74 = arith.cmpf ogt, %5, %73 : vector<1x8xf32>
    %cst_34 = arith.constant -1.000000e+09 : f32
    %75 = vector.shape_cast %74 : vector<1x8xi1> to vector<1x8xi1>
    %76 = vector.broadcast %75 : vector<1x8xi1> to vector<8x8xi1>
    %77 = vector.broadcast %cst_34 : f32 to vector<8x8xf32>
    %78 = arith.select %76, %72, %77 : vector<8x8xi1>, vector<8x8xf32>
    %cst_35 = arith.constant dense<0xFF800000> : vector<8xf32>
    %79 = vector.multi_reduction <maximumf>, %78, %cst_35 [1] : vector<8x8xf32> to vector<8xf32>
    %80 = vector.shape_cast %79 : vector<8xf32> to vector<8x1xf32>
    %81 = vector.broadcast %80 : vector<8x1xf32> to vector<8x8xf32>
    %82 = arith.subf %78, %81 : vector<8x8xf32>
    %83 = math.exp %82 : vector<8x8xf32>
    %cst_36 = arith.constant dense<0.000000e+00> : vector<8xf32>
    %84 = vector.multi_reduction <add>, %83, %cst_36 [1] : vector<8x8xf32> to vector<8xf32>
    %85 = vector.shape_cast %84 : vector<8xf32> to vector<8x1xf32>
    %86 = tpu.reciprocal %85 {approx = true} : vector<8x1xf32> -> vector<8x1xf32>
    %87 = vector.broadcast %86 : vector<8x1xf32> to vector<8x8xf32>
    %88 = arith.mulf %83, %87 : vector<8x8xf32>
    %89 = arith.truncf %88 : vector<8x8xf32> to vector<8x8xbf16>
    %90 = vector.extract_strided_slice %22 {offsets = [0, 16], sizes = [8, 8], strides = [1, 1]} : vector<8x32xbf16> to vector<8x8xbf16>
    %cst_37 = arith.constant dense<0.000000e+00> : vector<8x8xf32>
    %91 = tpu.matmul %89, %90, %cst_37 {dimension_numbers = #tpu.dot_dimension_numbers<[1], [0], [0], [1], [0, 0, 1, 1], [], []>} : vector<8x8xbf16>, vector<8x8xbf16>, vector<8x8xf32> -> vector<8x8xf32>
    %92 = vector.extract_strided_slice %16 {offsets = [0, 24], sizes = [8, 8], strides = [1, 1]} : vector<8x32xbf16> to vector<8x8xbf16>
    %93 = vector.extract_strided_slice %20 {offsets = [0, 24], sizes = [8, 8], strides = [1, 1]} : vector<8x32xbf16> to vector<8x8xbf16>
    %94 = tpu.transpose %93, [1, 0] : vector<8x8xbf16> -> vector<8x8xbf16>
    %cst_38 = arith.constant dense<0.000000e+00> : vector<8x8xf32>
    %95 = tpu.matmul %92, %94, %cst_38 {dimension_numbers = #tpu.dot_dimension_numbers<[1], [0], [0], [1], [0, 0, 1, 1], [], []>} : vector<8x8xbf16>, vector<8x8xbf16>, vector<8x8xf32> -> vector<8x8xf32>
    %cst_39 = arith.constant 0.000000e+00 : f32
    %96 = vector.broadcast %cst_39 : f32 to vector<1x8xf32>
    %97 = arith.cmpf ogt, %5, %96 : vector<1x8xf32>
    %cst_40 = arith.constant -1.000000e+09 : f32
    %98 = vector.shape_cast %97 : vector<1x8xi1> to vector<1x8xi1>
    %99 = vector.broadcast %98 : vector<1x8xi1> to vector<8x8xi1>
    %100 = vector.broadcast %cst_40 : f32 to vector<8x8xf32>
    %101 = arith.select %99, %95, %100 : vector<8x8xi1>, vector<8x8xf32>
    %cst_41 = arith.constant dense<0xFF800000> : vector<8xf32>
    %102 = vector.multi_reduction <maximumf>, %101, %cst_41 [1] : vector<8x8xf32> to vector<8xf32>
    %103 = vector.shape_cast %102 : vector<8xf32> to vector<8x1xf32>
    %104 = vector.broadcast %103 : vector<8x1xf32> to vector<8x8xf32>
    %105 = arith.subf %101, %104 : vector<8x8xf32>
    %106 = math.exp %105 : vector<8x8xf32>
    %cst_42 = arith.constant dense<0.000000e+00> : vector<8xf32>
    %107 = vector.multi_reduction <add>, %106, %cst_42 [1] : vector<8x8xf32> to vector<8xf32>
    %108 = vector.shape_cast %107 : vector<8xf32> to vector<8x1xf32>
    %109 = tpu.reciprocal %108 {approx = true} : vector<8x1xf32> -> vector<8x1xf32>
    %110 = vector.broadcast %109 : vector<8x1xf32> to vector<8x8xf32>
    %111 = arith.mulf %106, %110 : vector<8x8xf32>
    %112 = arith.truncf %111 : vector<8x8xf32> to vector<8x8xbf16>
    %113 = vector.extract_strided_slice %22 {offsets = [0, 24], sizes = [8, 8], strides = [1, 1]} : vector<8x32xbf16> to vector<8x8xbf16>
    %cst_43 = arith.constant dense<0.000000e+00> : vector<8x8xf32>
    %114 = tpu.matmul %112, %113, %cst_43 {dimension_numbers = #tpu.dot_dimension_numbers<[1], [0], [0], [1], [0, 0, 1, 1], [], []>} : vector<8x8xbf16>, vector<8x8xbf16>, vector<8x8xf32> -> vector<8x8xf32>
    %115 = tpu.concatenate %45, %68, %91, %114 in 1 : vector<8x8xf32>, vector<8x8xf32>, vector<8x8xf32>, vector<8x8xf32> -> vector<8x32xf32>
    %116 = arith.truncf %115 : vector<8x32xf32> to vector<8x32xbf16>
    %c0_44 = arith.constant 0 : index
    %c0_45 = arith.constant 0 : index
    %117 = vector.load %arg9[%c0_44, %c0_45] : memref<32x32xbf16, #tpu.memory_space<vmem>>, vector<32x32xbf16>
    %cst_46 = arith.constant dense<0.000000e+00> : vector<8x32xf32>
    %118 = tpu.matmul %116, %117, %cst_46 {dimension_numbers = #tpu.dot_dimension_numbers<[1], [0], [0], [1], [0, 0, 1, 1], [], []>} : vector<8x32xbf16>, vector<32x32xbf16>, vector<8x32xf32> -> vector<8x32xf32>
    %119 = vector.broadcast %6 : f32 to vector<8x32xf32>
    %120 = arith.mulf %1, %119 : vector<8x32xf32>
    %cst_47 = arith.constant 1.000000e+00 : f32
    %121 = arith.subf %cst_47, %6 : f32
    %122 = vector.broadcast %121 : f32 to vector<8x32xf32>
    %123 = arith.mulf %3, %122 : vector<8x32xf32>
    %124 = arith.addf %120, %123 : vector<8x32xf32>
    %125 = arith.addf %124, %118 : vector<8x32xf32>
    %c0_48 = arith.constant 0 : index
    %c0_49 = arith.constant 0 : index
    %126 = vector.load %arg14[%c0_48, %c0_49] : memref<1x32xf32, #tpu.memory_space<vmem>>, vector<1x32xf32>
    %127 = vector.shape_cast %126 : vector<1x32xf32> to vector<32xf32>
    %c0_50 = arith.constant 0 : index
    %c0_51 = arith.constant 0 : index
    %128 = vector.load %arg15[%c0_50, %c0_51] : memref<1x32xf32, #tpu.memory_space<vmem>>, vector<1x32xf32>
    %129 = vector.shape_cast %128 : vector<1x32xf32> to vector<32xf32>
    %cst_52 = arith.constant dense<0.000000e+00> : vector<8xf32>
    %130 = vector.multi_reduction <add>, %125, %cst_52 [1] : vector<8x32xf32> to vector<8xf32>
    %131 = vector.shape_cast %130 : vector<8xf32> to vector<8x1xf32>
    %cst_53 = arith.constant 3.200000e+01 : f32
    %132 = vector.broadcast %cst_53 : f32 to vector<8x1xf32>
    %133 = arith.divf %131, %132 : vector<8x1xf32>
    %134 = vector.broadcast %133 : vector<8x1xf32> to vector<8x32xf32>
    %135 = arith.subf %125, %134 : vector<8x32xf32>
    %136 = arith.mulf %135, %135 : vector<8x32xf32>
    %cst_54 = arith.constant dense<0.000000e+00> : vector<8xf32>
    %137 = vector.multi_reduction <add>, %136, %cst_54 [1] : vector<8x32xf32> to vector<8xf32>
    %138 = vector.shape_cast %137 : vector<8xf32> to vector<8x1xf32>
    %cst_55 = arith.constant 3.200000e+01 : f32
    %139 = vector.broadcast %cst_55 : f32 to vector<8x1xf32>
    %140 = arith.divf %138, %139 : vector<8x1xf32>
    %141 = vector.broadcast %133 : vector<8x1xf32> to vector<8x32xf32>
    %142 = arith.subf %125, %141 : vector<8x32xf32>
    %cst_56 = arith.constant 9.99999974E-6 : f32
    %143 = vector.broadcast %cst_56 : f32 to vector<8x1xf32>
    %144 = arith.addf %140, %143 : vector<8x1xf32>
    %145 = math.rsqrt %144 : vector<8x1xf32>
    %146 = vector.broadcast %145 : vector<8x1xf32> to vector<8x32xf32>
    %147 = arith.mulf %142, %146 : vector<8x32xf32>
    %148 = vector.shape_cast %127 : vector<32xf32> to vector<1x32xf32>
    %149 = vector.broadcast %148 : vector<1x32xf32> to vector<8x32xf32>
    %150 = arith.mulf %147, %149 : vector<8x32xf32>
    %151 = vector.shape_cast %129 : vector<32xf32> to vector<1x32xf32>
    %152 = vector.broadcast %151 : vector<1x32xf32> to vector<8x32xf32>
    %153 = arith.addf %150, %152 : vector<8x32xf32>
    %154 = arith.truncf %153 : vector<8x32xf32> to vector<8x32xbf16>
    %c0_57 = arith.constant 0 : index
    %c0_58 = arith.constant 0 : index
    %155 = vector.load %arg10[%c0_57, %c0_58] : memref<32x64xbf16, #tpu.memory_space<vmem>>, vector<32x64xbf16>
    %cst_59 = arith.constant dense<0.000000e+00> : vector<8x64xf32>
    %156 = tpu.matmul %154, %155, %cst_59 {dimension_numbers = #tpu.dot_dimension_numbers<[1], [0], [0], [1], [0, 0, 1, 1], [], []>} : vector<8x32xbf16>, vector<32x64xbf16>, vector<8x64xf32> -> vector<8x64xf32>
    %c0_60 = arith.constant 0 : index
    %c0_61 = arith.constant 0 : index
    %157 = vector.load %arg11[%c0_60, %c0_61] : memref<1x64xf32, #tpu.memory_space<vmem>>, vector<1x64xf32>
    %158 = vector.shape_cast %157 : vector<1x64xf32> to vector<64xf32>
    %159 = vector.shape_cast %158 : vector<64xf32> to vector<1x64xf32>
    %160 = vector.broadcast %159 : vector<1x64xf32> to vector<8x64xf32>
    %161 = arith.addf %156, %160 : vector<8x64xf32>
    %cst_62 = arith.constant 0.000000e+00 : f32
    %162 = vector.broadcast %cst_62 : f32 to vector<8x64xf32>
    %163 = arith.maximumf %161, %162 : vector<8x64xf32>
    %164 = arith.truncf %163 : vector<8x64xf32> to vector<8x64xbf16>
    %c0_63 = arith.constant 0 : index
    %c0_64 = arith.constant 0 : index
    %165 = vector.load %arg12[%c0_63, %c0_64] : memref<64x32xbf16, #tpu.memory_space<vmem>>, vector<64x32xbf16>
    %cst_65 = arith.constant dense<0.000000e+00> : vector<8x32xf32>
    %166 = tpu.matmul %164, %165, %cst_65 {dimension_numbers = #tpu.dot_dimension_numbers<[1], [0], [0], [1], [0, 0, 1, 1], [], []>} : vector<8x64xbf16>, vector<64x32xbf16>, vector<8x32xf32> -> vector<8x32xf32>
    %c0_66 = arith.constant 0 : index
    %c0_67 = arith.constant 0 : index
    %167 = vector.load %arg13[%c0_66, %c0_67] : memref<1x32xf32, #tpu.memory_space<vmem>>, vector<1x32xf32>
    %168 = vector.shape_cast %167 : vector<1x32xf32> to vector<32xf32>
    %169 = vector.shape_cast %168 : vector<32xf32> to vector<1x32xf32>
    %170 = vector.broadcast %169 : vector<1x32xf32> to vector<8x32xf32>
    %171 = arith.addf %166, %170 : vector<8x32xf32>
    %172 = vector.broadcast %7 : f32 to vector<8x32xf32>
    %173 = arith.mulf %153, %172 : vector<8x32xf32>
    %cst_68 = arith.constant 1.000000e+00 : f32
    %174 = arith.subf %cst_68, %7 : f32
    %175 = vector.broadcast %174 : f32 to vector<8x32xf32>
    %176 = arith.mulf %3, %175 : vector<8x32xf32>
    %177 = arith.addf %173, %176 : vector<8x32xf32>
    %178 = arith.addf %177, %171 : vector<8x32xf32>
    %c0_69 = arith.constant 0 : index
    %c0_70 = arith.constant 0 : index
    %179 = vector.load %arg16[%c0_69, %c0_70] : memref<1x32xf32, #tpu.memory_space<vmem>>, vector<1x32xf32>
    %180 = vector.shape_cast %179 : vector<1x32xf32> to vector<32xf32>
    %c0_71 = arith.constant 0 : index
    %c0_72 = arith.constant 0 : index
    %181 = vector.load %arg17[%c0_71, %c0_72] : memref<1x32xf32, #tpu.memory_space<vmem>>, vector<1x32xf32>
    %182 = vector.shape_cast %181 : vector<1x32xf32> to vector<32xf32>
    %cst_73 = arith.constant dense<0.000000e+00> : vector<8xf32>
    %183 = vector.multi_reduction <add>, %178, %cst_73 [1] : vector<8x32xf32> to vector<8xf32>
    %184 = vector.shape_cast %183 : vector<8xf32> to vector<8x1xf32>
    %cst_74 = arith.constant 3.200000e+01 : f32
    %185 = vector.broadcast %cst_74 : f32 to vector<8x1xf32>
    %186 = arith.divf %184, %185 : vector<8x1xf32>
    %187 = vector.broadcast %186 : vector<8x1xf32> to vector<8x32xf32>
    %188 = arith.subf %178, %187 : vector<8x32xf32>
    %189 = arith.mulf %188, %188 : vector<8x32xf32>
    %cst_75 = arith.constant dense<0.000000e+00> : vector<8xf32>
    %190 = vector.multi_reduction <add>, %189, %cst_75 [1] : vector<8x32xf32> to vector<8xf32>
    %191 = vector.shape_cast %190 : vector<8xf32> to vector<8x1xf32>
    %cst_76 = arith.constant 3.200000e+01 : f32
    %192 = vector.broadcast %cst_76 : f32 to vector<8x1xf32>
    %193 = arith.divf %191, %192 : vector<8x1xf32>
    %194 = vector.broadcast %186 : vector<8x1xf32> to vector<8x32xf32>
    %195 = arith.subf %178, %194 : vector<8x32xf32>
    %cst_77 = arith.constant 9.99999974E-6 : f32
    %196 = vector.broadcast %cst_77 : f32 to vector<8x1xf32>
    %197 = arith.addf %193, %196 : vector<8x1xf32>
    %198 = math.rsqrt %197 : vector<8x1xf32>
    %199 = vector.broadcast %198 : vector<8x1xf32> to vector<8x32xf32>
    %200 = arith.mulf %195, %199 : vector<8x32xf32>
    %201 = vector.shape_cast %180 : vector<32xf32> to vector<1x32xf32>
    %202 = vector.broadcast %201 : vector<1x32xf32> to vector<8x32xf32>
    %203 = arith.mulf %200, %202 : vector<8x32xf32>
    %204 = vector.shape_cast %182 : vector<32xf32> to vector<1x32xf32>
    %205 = vector.broadcast %204 : vector<1x32xf32> to vector<8x32xf32>
    %206 = arith.addf %203, %205 : vector<8x32xf32>
    %c0_78 = arith.constant 0 : index
    %c0_79 = arith.constant 0 : index
    %c0_80 = arith.constant 0 : index
    %207 = vector.load %arg18[%c0_78, %c0_79, %c0_80] : memref<1x8x32xf32, #tpu.memory_space<vmem>>, vector<1x8x32xf32>
    %208 = vector.shape_cast %207 : vector<1x8x32xf32> to vector<8x32xf32>
    %209 = vector.shape_cast %206 : vector<8x32xf32> to vector<1x8x32xf32>
    tpu.vector_store %arg18[%c0_78, %c0_79, %c0_80], %209 {strides = array<i32>} : memref<1x8x32xf32, #tpu.memory_space<vmem>>, vector<1x8x32xf32>,
    return
  }
  func.func @transform_0(%arg0: i32, %arg1: i32) -> i32 {
    %c0_i32 = arith.constant 0 : i32
    %c0_i32_0 = arith.constant 0 : i32
    return %c0_i32 : i32
  }
  func.func @transform_1(%arg0: i32, %arg1: i32) -> (i32, i32, i32) {
    %c0_i32 = arith.constant 0 : i32
    %c0_i32_0 = arith.constant 0 : i32
    return %arg0, %arg1, %c0_i32 : i32, i32, i32
  }
  func.func @transform_2(%arg0: i32, %arg1: i32) -> (i32, i32, i32) {
    %c0_i32 = arith.constant 0 : i32
    %c0_i32_0 = arith.constant 0 : i32
    %c0_i32_1 = arith.constant 0 : i32
    return %arg0, %c0_i32, %c0_i32_0 : i32, i32, i32
  }
  func.func @transform_3(%arg0: i32, %arg1: i32) -> (i32, i32, i32) {
    %c0_i32 = arith.constant 0 : i32
    %c0_i32_0 = arith.constant 0 : i32
    return %arg0, %arg1, %c0_i32 : i32, i32, i32
  }
  func.func @transform_4(%arg0: i32, %arg1: i32) -> (i32, i32, i32) {
    %c0_i32 = arith.constant 0 : i32
    %c0_i32_0 = arith.constant 0 : i32
    %c0_i32_1 = arith.constant 0 : i32
    return %arg0, %c0_i32, %c0_i32_0 : i32, i32, i32
  }
  func.func @transform_5(%arg0: i32, %arg1: i32) -> (i32, i32) {
    %c0_i32 = arith.constant 0 : i32
    %c0_i32_0 = arith.constant 0 : i32
    %c0_i32_1 = arith.constant 0 : i32
    return %c0_i32, %c0_i32_0 : i32, i32
  }
  func.func @transform_6(%arg0: i32, %arg1: i32) -> (i32, i32) {
    %c0_i32 = arith.constant 0 : i32
    %c0_i32_0 = arith.constant 0 : i32
    %c0_i32_1 = arith.constant 0 : i32
    return %c0_i32, %c0_i32_0 : i32, i32
  }
  func.func @transform_7(%arg0: i32, %arg1: i32) -> (i32, i32) {
    %c0_i32 = arith.constant 0 : i32
    %c0_i32_0 = arith.constant 0 : i32
    %c0_i32_1 = arith.constant 0 : i32
    return %c0_i32, %c0_i32_0 : i32, i32
  }
  func.func @transform_8(%arg0: i32, %arg1: i32) -> (i32, i32) {
    %c0_i32 = arith.constant 0 : i32
    %c0_i32_0 = arith.constant 0 : i32
    %c0_i32_1 = arith.constant 0 : i32
    return %c0_i32, %c0_i32_0 : i32, i32
  }
  func.func @transform_9(%arg0: i32, %arg1: i32) -> (i32, i32) {
    %c0_i32 = arith.constant 0 : i32
    %c0_i32_0 = arith.constant 0 : i32
    %c0_i32_1 = arith.constant 0 : i32
    return %c0_i32, %c0_i32_0 : i32, i32
  }
  func.func @transform_10(%arg0: i32, %arg1: i32) -> (i32, i32) {
    %c0_i32 = arith.constant 0 : i32
    %c0_i32_0 = arith.constant 0 : i32
    %c0_i32_1 = arith.constant 0 : i32
    return %c0_i32, %c0_i32_0 : i32, i32
  }
  func.func @transform_11(%arg0: i32, %arg1: i32) -> (i32, i32) {
    %c0_i32 = arith.constant 0 : i32
    %c0_i32_0 = arith.constant 0 : i32
    %c0_i32_1 = arith.constant 0 : i32
    return %c0_i32, %c0_i32_0 : i32, i32
  }
  func.func @transform_12(%arg0: i32, %arg1: i32) -> (i32, i32) {
    %c0_i32 = arith.constant 0 : i32
    %c0_i32_0 = arith.constant 0 : i32
    %c0_i32_1 = arith.constant 0 : i32
    return %c0_i32, %c0_i32_0 : i32, i32
  }
  func.func @transform_13(%arg0: i32, %arg1: i32) -> (i32, i32) {
    %c0_i32 = arith.constant 0 : i32
    %c0_i32_0 = arith.constant 0 : i32
    %c0_i32_1 = arith.constant 0 : i32
    return %c0_i32, %c0_i32_0 : i32, i32
  }
  func.func @transform_14(%arg0: i32, %arg1: i32) -> (i32, i32) {
    %c0_i32 = arith.constant 0 : i32
    %c0_i32_0 = arith.constant 0 : i32
    %c0_i32_1 = arith.constant 0 : i32
    return %c0_i32, %c0_i32_0 : i32, i32
  }
  func.func @transform_15(%arg0: i32, %arg1: i32) -> (i32, i32) {
    %c0_i32 = arith.constant 0 : i32
    %c0_i32_0 = arith.constant 0 : i32
    %c0_i32_1 = arith.constant 0 : i32
    return %c0_i32, %c0_i32_0 : i32, i32
  }
  func.func @transform_16(%arg0: i32, %arg1: i32) -> (i32, i32, i32) {
    %c0_i32 = arith.constant 0 : i32
    %c0_i32_0 = arith.constant 0 : i32
    return %arg0, %arg1, %c0_i32 : i32, i32, i32
  }
}

</mosaic_0001>

<bundles_post_ra>
// kernel: tpu_custom_call.1
= control target key start
LH: loop header
LB: loop body
LE: loop exit
PB: predicated region body
PF: predicated region fallthrough
CT: control target
= control target key end

     0   :  { %s2774_s0 = inlined_call_operand.hbm [shape: f32[2], index: 0, kind: input, shape index: {}]   ;;  %s2775_s1 = inlined_call_operand.vmem [shape: f32[2,8,32], index: 1, kind: input, shape index: {}]   ;;  %s2776_s2 = inlined_call_operand.vmem [shape: f32[2,8,32], index: 2, kind: input, shape index: {}]   ;;  %s2777_s3 = inlined_call_operand.vmem [shape: f32[2,8,32], index: 3, kind: input, shape index: {}]   ;;  %s2778_s4 = inlined_call_operand.vmem [shape: f32[2,1,8], index: 4, kind: input, shape index: {}]   ;;  %s2779_s5 = inlined_call_operand.hbm [shape: bf16[32,32], index: 5, kind: input, shape index: {}]   ;;  %s2780_s6 = inlined_call_operand.hbm [shape: bf16[32,64], index: 6, kind: input, shape index: {}]   ;;  %s2781_s7 = inlined_call_operand.hbm [shape: bf16[32,32], index: 7, kind: input, shape index: {}]   ;;  %s2782_s8 = inlined_call_operand.hbm [shape: bf16[32,64], index: 8, kind: input, shape index: {}]   ;;  %s2783_s9 = inlined_call_operand.hbm [shape: f32[1,64], index: 9, kind: input, shape index: {}]   ;;  %s2784_s10 = inlined_call_operand.vmem [shape: bf16[64,32], index: 10, kind: input, shape index: {}]   ;;  %s2785_s11 = inlined_call_operand.vmem [shape: f32[1,32], index: 11, kind: input, shape index: {}]   ;;  %s2786_s12 = inlined_call_operand.vmem [shape: f32[1,32], index: 12, kind: input, shape index: {}]   ;;  %s2787_s13 = inlined_call_operand.vmem [shape: f32[1,32], index: 13, kind: input, shape index: {}]   ;;  %s2788_s14 = inlined_call_operand.vmem [shape: f32[1,32], index: 14, kind: input, shape index: {}]   ;;  %s2789_s15 = inlined_call_operand.vmem [shape: f32[1,32], index: 15, kind: input, shape index: {}]   ;;  %s2790_s16 = inlined_call_operand.hbm [shape: f32[2,8,32], index: 16, kind: output, shape index: {}]  }
   0x1   :  { %2803 = sst [smem:[#allocation28_spill]] %s2774_s0 }
   0x2   :  { %2804 = sst [smem:[#allocation29_spill]] %s2780_s6 }
   0x3   :  { %2805 = sst [smem:[#allocation30_spill]] %s2788_s14 }
   0x4   :  { %2806 = sst [smem:[#allocation31_spill]] %s2789_s15 }
   0x5   :  { %2807 = sst [smem:[#allocation32_spill]] %s2790_s16 }
   0x6   :  { %21 = vsyncpa [#allocation5], 0 }
   0x7   :  { %22 = vsyncpa [#allocation3], 0 }
   0x8   :  { %23 = vsyncpa [#allocation8], 0 }
   0x9   :  { %24 = vsyncpa [#allocation11], 0 }
   0xa   :  { %25 = vsyncpa [#allocation4], 0 }
   0xb   :  { %27 = vsyncpa [#allocation4 + $0x1], 0  ;;  %s2439_s21 = smov 0   ;;  %s2441_s22 = smov 0  }
   0xc   :  { %s2443_s23 = smov 0   ;;  %s2445_s24 = smov 0  }
   0xd   :  { %s2447_s25 = smov 0   ;;  %s2449_s26 = smov 0  }
   0xe LB: > { %2808 = sst [smem:[#allocation19_spill]] %s2310_s21  ;;  %s1752_s27 = sadd.s32 4294967295, %s2330_s26   ;;  %s2330_s26 = sphi %s2449_s26, %s33_s26   ;;  %s2326_s25 = sphi %s2447_s25, %s2839_s25   ;;  %s2322_s24 = sphi %s2445_s24, %s2838_s24   ;;  %s2318_s23 = sphi %s2443_s23, %s2837_s23   ;;  %s2314_s22 = sphi %s2441_s22, %s2836_s22   ;;  %s2310_s21 = sphi %s2439_s21, %s2835_s21  }
   0xf   : > { %2809 = sst [smem:[#allocation20_spill]] %s2314_s22  ;;  %s1753_s28 = sadd.s32 4294967294, %s2330_s26  }
  0x10   : > { %2810 = sst [smem:[#allocation21_spill]] %s2318_s23  ;;  %s45_s29 = sadd.s32 1, %s2326_s25 }
  0x11   : > { %2811 = sst [smem:[#allocation22_spill]] %s2326_s25  ;;  %s414_s30 = sadd.s32 1, %s2318_s23 }
  0x12   : > { %2812 = sst [smem:[#allocation23_spill]] %s2330_s26  ;;  %p47_p0 = scmp.ge.s32.totalorder %s45_s29, 2 }
  0x13   : > { %p424_p1 = scmp.ne.s32.totalorder %s2318_s23, %s2314_s22  ;;  %p425_p2 = scmp.eq.s32.totalorder %s1752_s27, 1 }
  0x14   : > { %p430_p3 = scmp.ne.s32.totalorder %s2314_s22, %s2310_s21  ;;  %s2841_s29 = smov (%p47_p0, %s45_s29), 0 }
  0x15   : > { %2813 = sst [smem:[#allocation24_spill]] %s2841_s29  ;;  %p2479_p4 = por %p425_p2, %p424_p1 }
  0x16   : > { %p431_p5 = scmp.eq.s32.totalorder %s1753_s28, 1  ;;  %s409_s17 = ssub.s32 %s2326_s25, %s2841_s29 }
  0x17   : > { %s2814_s0 = scalar_select %p2479_p4, 1, 0 }
  0x18   : > { %p1754_p6 = scmp.ge.s32.totalorder %s2330_s26, 1  ;;  %p412_p7 = scmp.eq.s32.totalorder %s409_s17, 0 }
  0x19   : > { %2815 = sst [smem:[#allocation25_spill]] %s2814_s0  ;;  %p2486_p8 = por %p431_p5, %p430_p3 }
  0x1a   : > { %p438_p9 = scmp.lt.s32.totalorder %s2330_s26, 3  ;;  %p2498_p11 = scmp.eq.s32.totalorder %s1752_s27, 0 }
  0x1b   : > { %s2816_s18 = scalar_select %p2486_p8, 1, 0 }
  0x1c   : > { %s2492_s19 = scalar_select %p412_p7, %s2318_s23, %s414_s30  }
  0x1d   : > { %2817 = sst [smem:[#allocation26_spill]] %s2816_s18  ;;  %p2494_p10 = pnand %p1754_p6, %p438_p9 }
  0x1e   : > { %2818 = sst [smem:[#allocation27_spill]] %s2492_s19  ;;  %s2332_s28 = smov [#allocation7]  }
  0x1f   : > { %p1960_p12 = pneg %p2494_p10  ;;  %s472_s17 = sshll.u32 %s2332_s28, 4  ;;  %s473_s17 = int_to_ptr.vmem [resolvable:$true] %s472_s17 }
  0x20   : > { %s2333_s30 = smov [#allocation10]   ;;  %s2108_s19 = scalar_lea.vmem %s473_s17, 256 }
  0x21   : > { %p2506_p13 = pnand %p2498_p11, %p1960_p12  ;;  %s498_s25 = sshll.u32 %s2333_s30, 4  ;;  %s499_s25 = int_to_ptr.vmem [resolvable:$true] %s498_s25 }
  0x22   : > { %p2109_p1 = scmp.ne.s32.totalorder %s473_s17, %s2108_s19  ;;  %p2116_p5 = scmp.lt.s32.totalorder %s473_s17, %s473_s17 }
  0x23   : > { %p2512_p0 = pneg %p2506_p13  ;;  %p2117_p6 = scmp.lt.s32.totalorder %s2108_s19, %s2108_s19 }
  0x25   : > { %p2111_p2 = pnand %p2109_p1, %p2512_p0  ;;  %p2118_p7 = por %p2117_p6, %p2116_p5 }
  0x27   : > { %p2112_p3 = pneg %p2111_p2 }
  0x29   : > { %p2119_p9 = pnand %p2118_p7, %p2112_p3 }
  0x2b   : > { %2122 = shalt.err (!%p2119_p9)
}
  0x2c   : > { %s2334_s28 = smov 64   ;;  %s2335_s30 = smov 4  }
  0x2d   : > { %s2823_s6 = sld [smem:[#allocation29_spill]]  ;;  %s2134_s26 = scalar_lea.vmem %s499_s25, 256 }
  0x2e   : > { %p2135_p12 = scmp.ne.s32.totalorder %s499_s25, %s2134_s26  ;;  %p2142_p5 = scmp.lt.s32.totalorder %s499_s25, %s499_s25 }
  0x2f   : > { %p2143_p3 = scmp.lt.s32.totalorder %s2134_s26, %s2134_s26 }
  0x30   : > { %p2137_p1 = pnand %p2135_p12, %p2512_p0 }
  0x31   : > { %p2144_p6 = por %p2143_p3, %p2142_p5 }
  0x32   : > { %p2138_p2 = pneg %p2137_p1 }
  0x33   : > { %1969 = dma.hbm_to_vmem [thread:$0]  (!%p2506_p13), %s2823_s6, 256, %s473_s17, [#allocation8], %s2334_s28, %s2334_s28, %s2335_s30  }
  0x34   : > { %p2145_p7 = pnand %p2144_p6, %p2138_p2 }
  0x36   : > { %2148 = shalt.err (!%p2145_p7)
}
  0x37   : > { %1975 = dma.hbm_to_vmem [thread:$0]  (!%p2506_p13), %s2782_s8, 256, %s499_s25, [#allocation11], %s2334_s28, %s2334_s28, %s2335_s30  }
  0x38   : > { %s2336_s23 = smov [#allocation2]   ;;  %s2824_s6 = sld [smem:[#allocation28_spill]] }
  0x39   : > { %s2337_s26 = smov [#allocation6]   ;;  %s2338_s14 = smov [#allocation9]  }
  0x3a   : > { %s459_s15 = sshll.u32 %s2337_s26, 4  ;;  %s485_s0 = sshll.u32 %s2338_s14, 4  ;;  %s460_s15 = int_to_ptr.vmem [resolvable:$true] %s459_s15  ;;  %s486_s0 = int_to_ptr.vmem [resolvable:$true] %s485_s0 }
  0x3b   : > { %s2171_s22 = scalar_lea.vmem %s460_s15, 256  ;;  %p2179_p2 = scmp.lt.s32.totalorder %s460_s15, %s460_s15 }
  0x3c   : > { %p2172_p9 = scmp.ne.s32.totalorder %s460_s15, %s2171_s22  ;;  %p2180_p5 = scmp.lt.s32.totalorder %s2171_s22, %s2171_s22 }
  0x3e   : > { %1963 = dma.hbm_to_smem (!%p2506_p13), %s2824_s6, 16, %s2336_s23, [#allocation5]  }
  0x3f   : > { %p2174_p12 = pnand %p2172_p9, %p2512_p0  ;;  %p2181_p3 = por %p2180_p5, %p2179_p2 }
  0x41   : > { %p2175_p1 = pneg %p2174_p12 }
  0x43   : > { %p2182_p6 = pnand %p2181_p3, %p2175_p1 }
  0x45   : > { %2185 = shalt.err (!%p2182_p6)
}
  0x46   : > { %1966 = dma.hbm_to_vmem [thread:$0]  (!%p2506_p13), %s2779_s5, 256, %s460_s15, [#allocation3], %s2334_s28, %s2334_s28, %s2335_s30  }
  0x47   : > { %s2197_s14 = scalar_lea.vmem %s486_s0, 256  ;;  %p2205_p8 = scmp.lt.s32.totalorder %s486_s0, %s486_s0 }
  0x48   : > { %p2198_p7 = scmp.ne.s32.totalorder %s486_s0, %s2197_s14  ;;  %p2206_p4 = scmp.lt.s32.totalorder %s2197_s14, %s2197_s14 }
  0x4a   : > { %p2200_p9 = pnand %p2198_p7, %p2512_p0  ;;  %p2207_p2 = por %p2206_p4, %p2205_p8 }
  0x4c   : > { %p2201_p12 = pneg %p2200_p9 }
  0x4e   : > { %p2208_p1 = pnand %p2207_p2, %p2201_p12 }
  0x50   : > { %2211 = shalt.err (!%p2208_p1)
}
  0x51   : > { %1972 = dma.hbm_to_vmem [thread:$0]  (!%p2506_p13), %s2781_s7, 256, %s486_s0, [#allocation8], %s2334_s28, %s2334_s28, %s2335_s30  }
  0x52   : > { %s2339_s15 = smov [#allocation12]  }
  0x53   : > { %s512_s19 = sshll.u32 %s2339_s15, 4  ;;  %s513_s19 = int_to_ptr.vmem [resolvable:$true] %s512_s19 }
  0x54   : > { %s2223_s23 = scalar_lea.vmem %s513_s19, 16  ;;  %s2230_s18 = scalar_lea.vmem %s513_s19, 32 }
  0x55   : > { %p2224_p5 = scmp.ne.s32.totalorder %s513_s19, %s2223_s23  ;;  %p2231_p8 = scmp.lt.s32.totalorder %s513_s19, %s513_s19 }
  0x56   : > { %p2232_p6 = scmp.lt.s32.totalorder %s2230_s18, %s2223_s23 }
  0x57   : > { %p2226_p3 = pnand %p2224_p5, %p2512_p0 }
  0x58   : > { %p2233_p7 = por %p2232_p6, %p2231_p8 }
  0x59   : > { %p2227_p4 = pneg %p2226_p3 }
  0x5b   : > { %p2234_p9 = pnand %p2233_p7, %p2227_p4 }
  0x5d   : > { %2237 = shalt.err (!%p2234_p9)
}
  0x5e   : > { %1978 = dma.hbm_to_vmem [thread:$0]  (!%p2506_p13), %s2783_s9, 16, %s513_s19, [#allocation11]  }
  0x5f   : > { %576 = sbr.rel (%p2494_p10) target bundleno = 2507 (0x9cb), region = 84 }
  0x64   : > { %2289 = dma.done.wait (%p2498_p11), [#allocation5], 16  }
  0x65   : > { %2291 = vsyncadd (%p2498_p11), [#allocation5], 4294967280 }
  0x66   : > { %2293 = dma.done.wait (%p2498_p11), [#allocation3], 256  }
  0x67   : > { %2295 = vsyncadd (%p2498_p11), [#allocation3], 4294967040 }
  0x68   : > { %2297 = dma.done.wait (%p2498_p11), [#allocation8], 512  }
  0x69   : > { %2299 = vsyncadd (%p2498_p11), [#allocation8], 4294966784 }
  0x6a   : > { %2301 = dma.done.wait (%p2498_p11), [#allocation11], 272  }
  0x6b   : > { %2303 = vsyncadd (%p2498_p11), [#allocation11], 4294967024 }
  0x6c   : > { %602 = sfence }
  0x6d   : > { %v2065_v0 = vld [vmem:[#allocation6 + $0x8] sm:$0xff]   ;;  %v2340_v1 = vmov 0.0   ;;  %v2066_v2 = vld [vmem:[#allocation6] sm:$0xff]   ;;  %vm2341_vm0 = vmmov 0   ;;  %p663_p10 = scmp.lt.s32.totalorder %s2322_s24, 1  ;;  %vm709_vm1 = vcmask 261120   ;;  %v863_v29 = vlaneseq }
  0x6e   : > { %1842 = vmatprep.subr.bf16.mxu1 %v2340_v1  ;;  %1858 = vmatprep.subr.bf16.mxu0 %v2340_v1  ;;  %v2067_v4 = vld [vmem:[#allocation7 + $0x8] sm:$0xff]   ;;  %v2068_v6 = vld [vmem:[#allocation7] sm:$0xff]   ;;  %vm814_vm2 = vcmask 64512   ;;  %s2342_s16 = smov 112   ;;  %s2343_s14 = smov 120   ;;  %v2345_v33 = vmov 0  }
  0x6f   : > { %1843 = vmatpush3.bf16.msra.mxu1 %v2065_v0  ;;  %1846 = vmatprep.mubr.msk.bf16.mxu1 %vm2341_vm0, %v2340_v1  ;;  %s2595_s21 = scalar_select %p663_p10, %s2322_s24, 1  ;;  %v864_v31 = vshrl.u32 %v863_v29, 7  ;;  %vm887_vm5 = vcmask 1043456   ;;  %vm1278_vm6 = vcmask 130048   ;;  %vm1280_vm7 = vcmask 195584  }
  0x70   : > { %1844 = vmatprep.subr.bf16.mxu1 %v2340_v1  ;;  %1860 = vmatprep.mubr.msk.bf16.mxu0 %vm2341_vm0, %v2340_v1  ;;  %s2344_s22 = smov 104   ;;  %s2346_s23 = smov 96   ;;  %vm1487_vm8 = vcmask 523264  }
  0x71   : > { %s2598_s29 = sshll.u32 %s2595_s21, 3  ;;  %s683_s19 = scalar_lea.vmem %s2778_s4, %s2595_s21  ;;  %v865_v32 = vsub.s32 0, %v864_v31 }
  0x72   : > { %s669_s27 = scalar_lea.vmem %s2775_s1, %s2598_s29  ;;  %s673_s6 = scalar_lea.vmem %s2776_s2, %s2598_s29  ;;  %v687_v30 = vld [vmem:[%s683_s19] sm:$0x1] }
  0x73   : > { %1845 = vmatpush3.bf16.msra.mxu1 %v2066_v2  ;;  %v2605_v3 = vld [vmem:[%s669_s27] sm:$0xff]  ;;  %vm861_vm3 = vcmp.gt.f32.partialorder %v687_v30, 0.0  ;;  %s2347_s18 = smov 80   ;;  %s2348_s17 = smov 72  }
  0x74   : > { %1850 = vmatprep.subr.bf16.mxu1 %v2340_v1  ;;  %v690_v5 = vpack.c.bf16 %v2605_v3, %v2605_v3  ;;  %v691_v7 = vld [vmem:[%s673_s6] sm:$0xff]  ;;  %v862_v34 = vsel %vm861_vm3, 1, %v2345_v33  ;;  %s2349_s26 = smov 88   ;;  %s2350_s21 = smov 8  }
  0x75   : > { %v692_v8 = vpack.c.bf16 %v691_v7, %v691_v7  ;;  %v866_v35 = vrot.slane %v862_v34, %v865_v32  ;;  %s2351_s0 = smov 16   ;;  %s2352_s20 = smov 24  }
  0x76   : > { %1847 = vmatmul.mubr.msk.bf16.vlgmr.msra.gmra.mxu1 %vm709_vm1, %v690_v5  ;;  %s688_s27 = sld [smem:[#allocation2]] }
  0x77   : > { %1851 = vmatpush3.bf16.msra.mxu1 %v2067_v4  ;;  %1854 = vmatprep.mubr.msk.bf16.mxu1 %vm2341_vm0, %v2340_v1  ;;  %vm867_vm4 = vcmp.eq.s32.totalorder %v866_v35, 1  ;;  %s2825_s6 = sld [smem:[#allocation20_spill]] }
  0x78   : > { %1852 = vmatprep.subr.bf16.mxu1 %v2340_v1  ;;  %s2827_s15 = sld [smem:[#allocation30_spill]] }
  0x7b   : > { %1853 = vmatpush3.bf16.msra.mxu1 %v2068_v6 }
  0x7c   : > { %1864 = vmatprep.subr.bf16.mxu1 %v2340_v1  ;;  %s1344_s28 = ssub.f32 1.0, %s688_s27 }
  0x7e   : > { %1855 = vmatmul.mubr.msk.bf16.vlgmr.msra.gmra.mxu1 %vm709_vm1, %v692_v8 }
  0x7f   : > { %1866 = vmatprep.mubr.msk.bf16.mxu1 %vm2341_vm0, %v2340_v1 }
 0x136   : > { %v747_v9 = vpop.f32.mrf.mxu1 }
 0x137   : > { %v753_v18 = vpack.c.bf16 %v747_v9, %v747_v9 }
 0x138   : > { %v1848_v10 = vpop.f32.mrf.mxu1 }
 0x13a   : > { %v750_v11 = vpop.f32.mrf.mxu1 }
 0x13c   : > { %v1849_v12 = vpop.f32.mrf.mxu1 }
 0x13e   : > { %v807_v13 = vpop.f32.mrf.mxu1 }
 0x13f   : > { %v2621_v14 = vpack.c.bf16 %v807_v13, %v807_v13 }
 0x140   : > { %v1856_v15 = vpop.f32.mrf.mxu1 }
 0x141   : > { %1045 = vrot.lane.b32.xlu1 %v2621_v14, %s2342_s16  ;;  %934 = vrot.lane.b32.xlu0 %v2621_v14, %s2343_s14  ;;  %v819_v16 = vsel %vm814_vm2, %v2621_v14, 0 }
 0x142   : > { %v810_v17 = vpop.f32.mrf.mxu1  ;;  %1859 = vmatpush3.bf16.xpose.msra.mxu0 %v819_v16 }
 0x143   : > { %1870 = vmatprep.subr.bf16.mxu0 %v2340_v1 }
 0x144   : > { %v1857_v19 = vpop.f32.mrf.mxu1 }
 0x145   : > { %1043 = vrot.lane.b32.xlu1 %v753_v18, %s2342_s16  ;;  %932 = vrot.lane.b32.xlu0 %v753_v18, %s2343_s14  ;;  %s680_s16 = scalar_lea.vmem %s2777_s3, %s2598_s29  ;;  %s2826_s14 = sld [smem:[#allocation25_spill]] }
 0x149   : > { %1154 = vrot.lane.b32.xlu1 %v753_v18, %s2344_s22  ;;  %1156 = vrot.lane.b32.xlu0 %v2621_v14, %s2344_s22  ;;  %s2353_s22 = smov [#allocation13]  }
 0x14a   : > { %1861 = vmatmul.mubr.msk.bf16.vlgmr.msra.gmra.mxu0 %vm814_vm2, %v753_v18  ;;  %s2242_s25 = sshll.u32 %s2353_s22, 4  ;;  %s2243_s25 = int_to_ptr.vmem [resolvable:$false] %s2242_s25 }
 0x14b   : > { %1872 = vmatprep.mubr.msk.bf16.mxu0 %vm2341_vm0, %v2340_v1  ;;  %p2830_p13 = scmp.ne.s32.totalorder %s2826_s14, 0 }
 0x1b3   : > { %v935_v20 = vpop.permute.xlu0 %934  ;;  %v1046_v22 = vpop.permute.xlu1 %1045 }
 0x1b4   : > { %v940_v21 = vsel %vm814_vm2, %v935_v20, 0  ;;  %v1051_v24 = vsel %vm814_vm2, %v1046_v22, 0 }
 0x1b5   : > { %1871 = vmatpush3.bf16.xpose.msra.mxu0 %v940_v21 }
 0x1b6   : > { %1882 = vmatprep.subr.bf16.mxu0 %v2340_v1 }
 0x1b7   : > { %v933_v23 = vpop.permute.xlu0 %932  ;;  %v1044_v26 = vpop.permute.xlu1 %1043 }
 0x1bb   : > { %v1157_v25 = vpop.permute.xlu0 %1156  ;;  %v1155_v28 = vpop.permute.xlu1 %1154 }
 0x1bc   : > { %1873 = vmatmul.mubr.msk.bf16.vlgmr.msra.gmra.mxu0 %vm814_vm2, %v933_v23  ;;  %v1162_v27 = vsel %vm814_vm2, %v1157_v25, 0 }
 0x1bd   : > { %1883 = vmatpush3.bf16.xpose.msra.mxu0 %v1051_v24  ;;  %1884 = vmatprep.mubr.msk.bf16.mxu0 %vm2341_vm0, %v2340_v1 }
 0x1be   : > { %1894 = vmatprep.subr.bf16.mxu0 %v2340_v1 }
 0x1c4   : > { %1885 = vmatmul.mubr.msk.bf16.vlgmr.msra.gmra.mxu0 %vm814_vm2, %v1044_v26 }
 0x1c5   : > { %1895 = vmatpush3.bf16.xpose.msra.mxu0 %v1162_v27  ;;  %1896 = vmatprep.mubr.msk.bf16.mxu0 %vm2341_vm0, %v2340_v1 }
 0x1c6   : > { %1906 = vmatprep.subr.bf16.mxu0 %v2340_v1 }
 0x1cc   : > { %1897 = vmatmul.mubr.msk.bf16.vlgmr.msra.gmra.mxu0 %vm814_vm2, %v1155_v28 }
 0x1cd   : > { %1910 = vmatprep.mubr.msk.bf16.mxu0 %vm2341_vm0, %v2340_v1 }
 0x20a   : > { %v855_v36 = vpop.f32.mrf.mxu0 }
 0x20b   : > { %v868_v37 = vsel %vm867_vm4, %v855_v36, -1e+09 }
 0x20c   : > { %v1862_v38 = vpop.f32.mrf.mxu0  ;;  %v869_v39 = vsel %vm814_vm2, %v868_v37, -inf }
 0x20d   : > { %870 = vmax.xlane.f32.xlu0 %v869_v39 }
 0x20e   : > { %v858_v40 = vpop.f32.mrf.mxu0 }
 0x210   : > { %v1863_v41 = vpop.f32.mrf.mxu0 }
 0x27c   : > { %v976_v42 = vpop.f32.mrf.mxu0 }
 0x27d   : > { %v982_v43 = vsel %vm867_vm4, %v976_v42, -1e+09 }
 0x27e   : > { %v1874_v44 = vpop.f32.mrf.mxu0  ;;  %v983_v45 = vsel %vm814_vm2, %v982_v43, -inf }
 0x27f   : > { %984 = vmax.xlane.f32.xlu1 %v983_v45 }
 0x280   : > { %v979_v46 = vpop.f32.mrf.mxu0 }
 0x281   : > { %v2069_v46 = vld [vmem:[#allocation9 + $0x8] sm:$0xff]  }
 0x282   : > { %v1875_v47 = vpop.f32.mrf.mxu0  ;;  %1907 = vmatpush3.bf16.msra.mxu0 %v2069_v46 }
 0x283   : > { %1908 = vmatprep.subr.bf16.mxu0 %v2340_v1 }
 0x284   : > { %v1087_v48 = vpop.f32.mrf.mxu0 }
 0x285   : > { %v1093_v49 = vsel %vm867_vm4, %v1087_v48, -1e+09 }
 0x286   : > { %v1886_v50 = vpop.f32.mrf.mxu0  ;;  %v1094_v51 = vsel %vm814_vm2, %v1093_v49, -inf }
 0x287   : > { %1095 = vmax.xlane.f32.xlu0 %v1094_v51 }
 0x288   : > { %v1090_v52 = vpop.f32.mrf.mxu0 }
 0x28a   : > { %v1887_v53 = vpop.f32.mrf.mxu0 }
 0x28c   : > { %v1198_v54 = vpop.f32.mrf.mxu0 }
 0x28d   : > { %v1204_v55 = vsel %vm867_vm4, %v1198_v54, -1e+09 }
 0x28e   : > { %v1898_v56 = vpop.f32.mrf.mxu0  ;;  %v1205_v57 = vsel %vm814_vm2, %v1204_v55, -inf }
 0x28f   : > { %1206 = vmax.xlane.f32.xlu0 %v1205_v57 }
 0x290   : > { %v1201_v58 = vpop.f32.mrf.mxu0 }
 0x292   : > { %v1899_v59 = vpop.f32.mrf.mxu0 }
 0x296   : > { %v871_v60 = vpop.xlane.xlu0 %870 }
 0x297   : > { %v872_v61 = vsub.f32 %v868_v37, %v871_v60 }
 0x299   : > { %v873_v62 = vmul.f32 1.442695, %v872_v61 }
 0x29b   : > { %2077 = vpow2.f32 %v873_v62 }
 0x2a8   : > { %v2078_v63 = vpop.eup %2077 }
 0x2a9   : > { %v875_v0 = vsel %vm814_vm2, %v2078_v63, 0.0 }
 0x2aa   : > { %876 = vadd.xlane.f32.xlu1 %v875_v0 }
 0x2bb   : > { %882 = vrot.lane.b32.xlu1 %v2621_v14, %s2346_s23 }
 0x308   : > { %v985_v2 = vpop.xlane.xlu1 %984 }
 0x309   : > { %v986_v4 = vsub.f32 %v982_v43, %v985_v2 }
 0x30b   : > { %v987_v5 = vmul.f32 1.442695, %v986_v4 }
 0x30d   : > { %2079 = vpow2.f32 %v987_v5  ;;  %v686_v5 = vld [vmem:[%s680_s16] sm:$0xff]  ;;  %s660_s16 = sand.u32 1, %s2825_s6  }
 0x30e   : > { %s1769_s29 = sshll.u32 %s660_s16, 3  ;;  %s1569_s30 = scalar_lea.sflag [#allocation4], %s660_s16 }
 0x310   : > { %v1096_v6 = vpop.xlane.xlu0 %1095 }
 0x311   : > { %v1097_v7 = vsub.f32 %v1093_v49, %v1096_v6  ;;  %v2070_v49 = vld [vmem:[#allocation9] sm:$0xff]   ;;  %v1342_v6 = vstv %s688_s27 }
 0x312   : > { %1909 = vmatpush3.bf16.msra.mxu0 %v2070_v49 }
 0x313   : > { %v1098_v8 = vmul.f32 1.442695, %v1097_v7  ;;  %1922 = vmatprep.subr.bf16.mxu0 %v2340_v1  ;;  %v1345_v7 = vstv %s1344_s28 }
 0x315   : > { %2081 = vpow2.f32 %v1098_v8  ;;  %v1343_v8 = vmul.f32 %v1342_v6, %v2605_v3  ;;  %v2072_v3 = vld [vmem:[#allocation10] sm:$0xff]  }
 0x318   : > { %v1207_v9 = vpop.xlane.xlu0 %1206 }
 0x319   : > { %v1208_v10 = vsub.f32 %v1204_v55, %v1207_v9  ;;  %v1346_v9 = vmul.f32 %v1345_v7, %v686_v5 }
 0x31a   : > { %v2080_v11 = vpop.eup %2079 }
 0x31b   : > { %v1209_v12 = vmul.f32 1.442695, %v1208_v10  ;;  %v989_v13 = vsel %vm814_vm2, %v2080_v11, 0.0  ;;  %v1347_v10 = vadd.f32 %v1346_v9, %v1343_v8 }
 0x31c   : > { %990 = vadd.xlane.f32.xlu0 %v989_v13 }
 0x31d   : > { %2083 = vpow2.f32 %v1209_v12 }
 0x322   : > { %v2082_v15 = vpop.eup %2081 }
 0x323   : > { %v1100_v16 = vsel %vm814_vm2, %v2082_v15, 0.0 }
 0x324   : > { %1101 = vadd.xlane.f32.xlu1 %v1100_v16 }
 0x32a   : > { %v2084_v17 = vpop.eup %2083 }
 0x32b   : > { %v1211_v18 = vsel %vm814_vm2, %v2084_v17, 0.0 }
 0x32c   : > { %1212 = vadd.xlane.f32.xlu0 %v1211_v18 }
 0x333   : > { %v877_v19 = vpop.xlane.xlu1 %876 }
 0x334   : > { %2085 = vrcp.f32 %v877_v19 }
 0x335   : > { %1106 = vrot.lane.b32.xlu1 %v2621_v14, %s2347_s18  ;;  %s2828_s18 = sld [smem:[#allocation31_spill]] }
 0x337   : > { %v883_v20 = vpop.permute.xlu1 %882 }
 0x338   : > { %v889_v21 = vsel %vm887_vm5, %v883_v20, 0 }
 0x339   : > { %1865 = vmatpush3.bf16.msra.mxu1 %v889_v21  ;;  %1217 = vrot.lane.b32.xlu1 %v2621_v14, %s2348_s17  ;;  %s1806_s17 = sshll.u32 %s2322_s24, 7  ;;  %s2244_s24 = scalar_lea.vmem %s2243_s25, 256 }
 0x33a   : > { %1876 = vmatprep.subr.bf16.mxu1 %v2340_v1 }
 0x33b   : > { %v1804_v6 = vld [vmem:[%s2828_s18] ss:$0 sm:$0xff] }
 0x341   : > { %v2086_v22 = vpop.eup %2085 }
 0x342   : > { %995 = vrot.lane.b32.xlu0 %v2621_v14, %s2349_s26  ;;  %v879_v23 = vmul.f32 %v2086_v22, %v2078_v63  ;;  %s662_s26 = scalar_lea.vmem [#allocation13], %s1769_s29 }
 0x344   : > { %v880_v24 = vpack.c.bf16 %v879_v23, %v879_v23  ;;  %v2071_v23 = vld [vmem:[#allocation10 + $0x8] sm:$0xff]  }
 0x346   : > { %1867 = vmatmul.mubr.msk.bf16.vlgmr.msra.gmra.mxu1 %vm814_vm2, %v880_v24  ;;  %v2073_v24 = vld [vmem:[%s2784_s10 + $0x18] sm:$0xff]  }
 0x347   : > { %1878 = vmatprep.mubr.msk.bf16.mxu1 %vm2341_vm0, %v2340_v1 }
 0x3a5   : > { %v991_v25 = vpop.xlane.xlu0 %990 }
 0x3a6   : > { %2087 = vrcp.f32 %v991_v25  ;;  %v2074_v25 = vld [vmem:[%s2784_s10 + $0x10] sm:$0xff]  }
 0x3ad   : > { %v1102_v26 = vpop.xlane.xlu1 %1101 }
 0x3ae   : > { %2089 = vrcp.f32 %v1102_v26 }
 0x3b1   : > { %v1107_v32 = vpop.permute.xlu1 %1106 }
 0x3b2   : > { %v1112_v34 = vsel %vm887_vm5, %v1107_v32, 0  ;;  %v1792_v32 = vld [vmem:[%s2787_s13] ss:$0 sm:$0xff] }
 0x3b3   : > { %v2088_v27 = vpop.eup %2087 }
 0x3b4   : > { %v993_v29 = vmul.f32 %v2088_v27, %v2080_v11 }
 0x3b5   : > { %v1213_v28 = vpop.xlane.xlu0 %1212  ;;  %v1218_v36 = vpop.permute.xlu1 %1217 }
 0x3b6   : > { %2091 = vrcp.f32 %v1213_v28  ;;  %v994_v14 = vpack.c.bf16 %v993_v29, %v993_v29  ;;  %v1223_v39 = vsel %vm887_vm5, %v1218_v36, 0  ;;  %v2076_v36 = vld [vmem:[%s2784_s10] sm:$0xff]  }
 0x3b9   : > { %v996_v30 = vpop.permute.xlu0 %995 }
 0x3ba   : > { %v1001_v31 = vsel %vm887_vm5, %v996_v30, 0  ;;  %v1791_v30 = vld [vmem:[%s2786_s12] ss:$0 sm:$0xff] }
 0x3bb   : > { %1877 = vmatpush3.bf16.msra.mxu1 %v1001_v31  ;;  %v2090_v33 = vpop.eup %2089 }
 0x3bc   : > { %1888 = vmatprep.subr.bf16.mxu1 %v2340_v1  ;;  %v1104_v35 = vmul.f32 %v2090_v33, %v2082_v15 }
 0x3be   : > { %1879 = vmatmul.mubr.msk.bf16.vlgmr.msra.gmra.mxu1 %vm814_vm2, %v994_v14  ;;  %v1105_v37 = vpack.c.bf16 %v1104_v35, %v1104_v35  ;;  %v2075_v35 = vld [vmem:[%s2784_s10 + $0x8] sm:$0xff]  }
 0x3bf   : > { %1889 = vmatpush3.bf16.msra.mxu1 %v1112_v34  ;;  %1890 = vmatprep.mubr.msk.bf16.mxu1 %vm2341_vm0, %v2340_v1 }
 0x3c0   : > { %1900 = vmatprep.subr.bf16.mxu1 %v2340_v1 }
 0x3c3   : > { %v2092_v38 = vpop.eup %2091 }
 0x3c4   : > { %v1215_v40 = vmul.f32 %v2092_v38, %v2084_v17 }
 0x3c6   : > { %1891 = vmatmul.mubr.msk.bf16.vlgmr.msra.gmra.mxu1 %vm814_vm2, %v1105_v37  ;;  %v1216_v41 = vpack.c.bf16 %v1215_v40, %v1215_v40  ;;  %v1793_v37 = vld [vmem:[#allocation12] ss:$0 sm:$0xff] }
 0x3c7   : > { %1901 = vmatpush3.bf16.msra.mxu1 %v1223_v39  ;;  %1902 = vmatprep.mubr.msk.bf16.mxu1 %vm2341_vm0, %v2340_v1 }
 0x3c8   : > { %1914 = vmatprep.subr.bf16.mxu1 %v2340_v1 }
 0x3ce   : > { %1903 = vmatmul.mubr.msk.bf16.vlgmr.msra.gmra.mxu1 %vm814_vm2, %v1216_v41 }
 0x3cf   : > { %1918 = vmatprep.mubr.msk.bf16.mxu1 %vm2341_vm0, %v2340_v1  ;;  %1915 = vmatpush3.bf16.msra.mxu1 %v2071_v23 }
 0x3d0   : > { %1916 = vmatprep.subr.bf16.mxu1 %v2340_v1 }
 0x3d3   : > { %1917 = vmatpush3.bf16.msra.mxu1 %v2072_v3 }
 0x406   : > { %v925_v42 = vpop.f32.mrf.mxu1 }
 0x408   : > { %v1868_v43 = vpop.f32.mrf.mxu1 }
 0x40a   : > { %v928_v44 = vpop.f32.mrf.mxu1 }
 0x40c   : > { %v1869_v45 = vpop.f32.mrf.mxu1 }
 0x47e   : > { %v1037_v47 = vpop.f32.mrf.mxu1 }
 0x47f   : > { %1266 = vrot.lane.b32.xlu0 %v1037_v47, %s2350_s21  ;;  %s1583_s21 = sshll.u32 %s662_s26, 4  ;;  %s1584_s21 = int_to_ptr.vmem [resolvable:$true] %s1583_s21 }
 0x480   : > { %v1880_v48 = vpop.f32.mrf.mxu1  ;;  %s2238_s6 = scalar_lea.vmem %s1584_s21, 128  ;;  %p2245_p2 = scmp.lt.s32.totalorder %s1584_s21, %s2243_s25 }
 0x481   : > { %v1797_v48 = vld [vmem:[%s2785_s11] ss:$0 sm:$0xff]  ;;  %p2239_p11 = scmp.ne.s32.totalorder %s1584_s21, %s2238_s6  ;;  %p2246_p1 = scmp.lt.s32.totalorder %s2244_s24, %s2238_s6 }
 0x482   : > { %v1040_v50 = vpop.f32.mrf.mxu1 }
 0x483   : > { %p2240_p0 = pnand %p2239_p11, %p2830_p13  ;;  %p2247_p5 = por %p2246_p1, %p2245_p2 }
 0x484   : > { %v1881_v51 = vpop.f32.mrf.mxu1 }
 0x485   : > { %p2241_p12 = pneg %p2240_p0 }
 0x486   : > { %v1148_v52 = vpop.f32.mrf.mxu1 }
 0x487   : > { %1270 = vrot.lane.b32.xlu1 %v1148_v52, %s2351_s0  ;;  %p2248_p3 = pnand %p2247_p5, %p2241_p12 }
 0x488   : > { %v1892_v53 = vpop.f32.mrf.mxu1 }
 0x48a   : > { %v1151_v54 = vpop.f32.mrf.mxu1 }
 0x48c   : > { %v1893_v55 = vpop.f32.mrf.mxu1 }
 0x48e   : > { %v1259_v56 = vpop.f32.mrf.mxu1 }
 0x48f   : > { %1274 = vrot.lane.b32.xlu0 %v1259_v56, %s2352_s20  ;;  %s1773_s20 = sld [smem:[#allocation2 + $0x1]] }
 0x490   : > { %v1904_v57 = vpop.f32.mrf.mxu1 }
 0x492   : > { %v1262_v58 = vpop.f32.mrf.mxu1 }
 0x494   : > { %v1905_v59 = vpop.f32.mrf.mxu1 }
 0x495   : > { %s1533_s27 = ssub.f32 1.0, %s1773_s20  ;;  %v1531_v45 = vstv %s1773_s20 }
 0x497   : > { %v1534_v46 = vstv %s1533_s27  ;;  %s2829_s27 = sld [smem:[#allocation32_spill]] }
 0x498   : > { %v1535_v47 = vmul.f32 %v1534_v46, %v686_v5 }
 0x49d   : > { %s1581_s28 = scalar_lea.hbm %s2829_s27, %s1806_s17 }
 0x4f1   : > { %v1267_v60 = vpop.permute.xlu0 %1266 }
 0x4f2   : > { %v1277_v62 = vsel %vm814_vm2, %v925_v42, %v1267_v60 }
 0x4f9   : > { %v1271_v61 = vpop.permute.xlu1 %1270 }
 0x4fa   : > { %v1279_v63 = vsel %vm1278_vm6, %v1277_v62, %v1271_v61 }
 0x501   : > { %v1275_v0 = vpop.permute.xlu0 %1274 }
 0x502   : > { %v1281_v2 = vsel %vm1280_vm7, %v1279_v63, %v1275_v0 }
 0x503   : > { %v1282_v4 = vpack.c.bf16 %v1281_v2, %v1281_v2 }
 0x505   : > { %1911 = vmatmul.mubr.msk.bf16.vlgmr.msra.gmra.mxu0 %vm709_vm1, %v1282_v4  ;;  %v1803_v4 = vld [vmem:[%s2827_s15] ss:$0 sm:$0xff] }
 0x506   : > { %1930 = vmatprep.mubr.msk.bf16.mxu0 %vm2341_vm0, %v2340_v1  ;;  %1923 = vmatpush3.bf16.msra.mxu0 %v2073_v24 }
 0x507   : > { %1924 = vmatprep.subr.bf16.mxu0 %v2340_v1 }
 0x50a   : > { %1925 = vmatpush3.bf16.msra.mxu0 %v2074_v25 }
 0x50b   : > { %1926 = vmatprep.subr.bf16.mxu0 %v2340_v1 }
 0x50e   : > { %1927 = vmatpush3.bf16.msra.mxu0 %v2075_v35 }
 0x50f   : > { %1928 = vmatprep.subr.bf16.mxu0 %v2340_v1 }
 0x512   : > { %1929 = vmatpush3.bf16.msra.mxu0 %v2076_v36 }
 0x5c5   : > { %v1336_v11 = vpop.f32.mrf.mxu0 }
 0x5c6   : > { %v1348_v12 = vadd.f32 %v1347_v10, %v1336_v11 }
 0x5c7   : > { %v1912_v13 = vpop.f32.mrf.mxu0 }
 0x5c8   : > { %v1351_v15 = vsel %vm709_vm1, %v1348_v12, 0.0 }
 0x5c9   : > { %1352 = vadd.xlane.f32.xlu1 %v1351_v15  ;;  %v1339_v16 = vpop.f32.mrf.mxu0 }
 0x5cb   : > { %v1913_v17 = vpop.f32.mrf.mxu0 }
 0x652   : > { %v1353_v18 = vpop.xlane.xlu1 %1352 }
 0x653   : > { %v1355_v19 = vmul.f32 0.03125, %v1353_v18 }
 0x655   : > { %v1356_v20 = vsub.f32 %v1348_v12, %v1355_v19 }
 0x657   : > { %v1357_v21 = vmul.f32 %v1356_v20, %v1356_v20 }
 0x659   : > { %v1358_v22 = vsel %vm709_vm1, %v1357_v21, 0.0 }
 0x65a   : > { %1359 = vadd.xlane.f32.xlu0 %v1358_v22 }
 0x6e3   : > { %v1360_v26 = vpop.xlane.xlu0 %1359 }
 0x6e4   : > { %v1361_v27 = vmul.f32 0.03125, %v1360_v26 }
 0x6e6   : > { %v1362_v28 = vadd.f32 1e-05, %v1361_v27 }
 0x6e8   : > { %2093 = vrsqrt.f32 %v1362_v28 }
 0x6f5   : > { %v2094_v29 = vpop.eup %2093 }
 0x6f6   : > { %v1364_v31 = vmul.f32 %v2094_v29, %v1356_v20 }
 0x6f8   : > { %v1371_v14 = vmul.f32 %v1791_v30, %v1364_v31 }
 0x6fa   : > { %v1378_v33 = vadd.f32 %v1792_v32, %v1371_v14 }
 0x6fc   : > { %v1379_v34 = vpack.c.bf16 %v1378_v33, %v1378_v33  ;;  %v1532_v1 = vmul.f32 %v1531_v45, %v1378_v33 }
 0x6fe   : > { %1919 = vmatmul.mubr.msk.bf16.vlgmr.msra.gmra.mxu1 %vm709_vm1, %v1379_v34  ;;  %v1536_v51 = vadd.f32 %v1535_v47, %v1532_v1 }
 0x7be   : > { %v1440_v38 = vpop.f32.mrf.mxu1 }
 0x7bf   : > { %v1441_v39 = vadd.f32 %v1793_v37, %v1440_v38 }
 0x7c0   : > { %v1920_v40 = vpop.f32.mrf.mxu1 }
 0x7c1   : > { %v1446_v41 = vmax.f32 %v1441_v39, 0.0 }
 0x7c2   : > { %v1443_v42 = vpop.f32.mrf.mxu1 }
 0x7c3   : > { %v1447_v43 = vpack.c.bf16 %v1446_v41, %v1446_v41 }
 0x7c4   : > { %v1921_v44 = vpop.f32.mrf.mxu1 }
 0x7c5   : > { %1931 = vmatmul.mubr.msk.bf16.vlgmr.msra.gmra.mxu0 %vm1487_vm8, %v1447_v43 }
 0x885   : > { %v1525_v49 = vpop.f32.mrf.mxu0 }
 0x886   : > { %v1526_v50 = vadd.f32 %v1797_v48, %v1525_v49 }
 0x887   : > { %v1932_v52 = vpop.f32.mrf.mxu0 }
 0x888   : > { %v1537_v53 = vadd.f32 %v1536_v51, %v1526_v50 }
 0x889   : > { %v1528_v54 = vpop.f32.mrf.mxu0 }
 0x88a   : > { %v1540_v55 = vsel %vm709_vm1, %v1537_v53, 0.0 }
 0x88b   : > { %1541 = vadd.xlane.f32.xlu0 %v1540_v55  ;;  %v1933_v56 = vpop.f32.mrf.mxu0 }
 0x914   : > { %v1542_v57 = vpop.xlane.xlu0 %1541 }
 0x915   : > { %v1543_v58 = vmul.f32 0.03125, %v1542_v57 }
 0x917   : > { %v1544_v59 = vsub.f32 %v1537_v53, %v1543_v58 }
 0x919   : > { %v1545_v60 = vmul.f32 %v1544_v59, %v1544_v59 }
 0x91b   : > { %v1546_v61 = vsel %vm709_vm1, %v1545_v60, 0.0 }
 0x91c   : > { %1547 = vadd.xlane.f32.xlu1 %v1546_v61 }
 0x9a5   : > { %v1548_v62 = vpop.xlane.xlu1 %1547 }
 0x9a6   : > { %v1549_v63 = vmul.f32 0.03125, %v1548_v62 }
 0x9a8   : > { %v1550_v0 = vadd.f32 1e-05, %v1549_v63 }
 0x9aa   : > { %2095 = vrsqrt.f32 %v1550_v0 }
 0x9b7   : > { %v2096_v2 = vpop.eup %2095 }
 0x9b8   : > { %v1552_v5 = vmul.f32 %v2096_v2, %v1544_v59 }
 0x9ba   : > { %v1559_v7 = vmul.f32 %v1803_v4, %v1552_v5 }
 0x9bc   : > { %v1566_v8 = vadd.f32 %v1804_v6, %v1559_v7 }
 0x9be   : > { %1567 = vst.msk [vmem:[%s662_s26] sm:$0xff] %vm709_vm1, %v1566_v8 }
 0x9bf   : > { %2251 = shalt.err (!%p2248_p3)
}
 0x9c0   : > { %s2252_s29 = scalar_lea.hbm %s1581_s28, 128  ;;  %s2256_s19 = scalar_lea.hbm %s2829_s27, 256 }
 0x9c1   : > { %p2253_p4 = scmp.ne.s32.totalorder %s1581_s28, %s2252_s29  ;;  %p2257_p7 = scmp.lt.s32.totalorder %s1581_s28, %s2829_s27 }
 0x9c2   : > { %p2258_p9 = scmp.lt.s32.totalorder %s2256_s19, %s2252_s29 }
 0x9c3   : > { %p2254_p8 = pnand %p2253_p4, %p2830_p13 }
 0x9c4   : > { %p2259_p10 = por %p2258_p9, %p2257_p7 }
 0x9c5   : > { %p2255_p6 = pneg %p2254_p8 }
 0x9c7   : > { %p2260_p11 = pnand %p2259_p10, %p2255_p6 }
 0x9c9   : > { %2263 = shalt.err (!%p2260_p11)
}
 0x9ca   : > { %1958 = dma.vmem_to_hbm [thread:$0]  (%p2830_p13), %s1584_s21, 128, %s1581_s28, %s1569_s30  }
 0x9cb PF: > { %s2831_s17 = sld [smem:[#allocation23_spill]] }
 0x9cc   : > { %s2832_s26 = sld [smem:[#allocation19_spill]] }
 0x9cd   : > { %s2833_s0 = sld [smem:[#allocation26_spill]] }
 0x9d1   : > { %p1995_p0 = scmp.ge.s32.totalorder %s2831_s17, 2 }
 0x9d2   : > { %s1595_s20 = sand.u32 1, %s2832_s26  }
 0x9d3   : > { %p2834_p12 = scmp.ne.s32.totalorder %s2833_s0, 0  ;;  %s1596_s6 = scalar_lea.sflag [#allocation4], %s1595_s20 }
 0x9d5   : > { %p1980_p2 = pnand %p1995_p0, %p2834_p12 }
 0x9d7   : > { %p1981_p1 = pneg %p1980_p2 }
 0x9d9   : > { %2305 = dma.done.wait (%p1981_p1), %s1596_s6, 128  }
 0x9da   : > { %2307 = vsyncadd (%p1981_p1), %s1596_s6, 4294967168  ;;  %s33_s26 = sadd.s32 1, %s2831_s17   ;;  %s2835_s21 = sld [smem:[#allocation20_spill]] }
 0x9db   : > { %p30_p5 = scmp.ge.s32.totalorder %s33_s26, 4   ;;  %s2836_s22 = sld [smem:[#allocation21_spill]] }
 0x9dc   : > { %s2837_s23 = sld [smem:[#allocation27_spill]] }
 0x9dd   : > { %s2838_s24 = sld [smem:[#allocation22_spill]]  ;;  %32 = sbr.rel (!%p30_p5) target bundleno = 14 (0xe), region = 154 }
 0x9de   : > { %s2839_s25 = sld [smem:[#allocation24_spill]] }
 0x9e2   :  { %1601 = vsyncpa [#allocation3], 1 }
 0x9e3   :  { %1603 = vsyncpa [#allocation3 + $0x1], 1 }
 0x9e4   :  { %1604 = vsyncpa [#allocation8], 1 }
 0x9e5   :  { %1605 = vsyncpa [#allocation11], 1 }
 0x9e6   :  { %1606 = vsyncpa [#allocation4], 1 }
 0x9e7   :  { %1608 = vsyncpa [#allocation4 + $0x1], 1 }
 0x9e8   :  { %1609 = vsyncpa [#allocation5], 1 }
 0x9e9   :  { %1611 = vsyncpa [#allocation5 + $0x1], 1 }

</bundles_post_ra>
